<compile_context>
chip_gen: v6e
topology: v6e:2x2x1
jax: 0.10.0
libtpu: 0.0.40
codegen_flags: <defaults>
</compile_context>

<pallas_src>
import math
from functools import partial

import jax
import jax.numpy as jnp
from jax.experimental import pallas as pl
from jax.experimental.pallas import tpu as pltpu

# (C_in, C_out) for conv1..conv7 (k=1), fc1, fc2 — in forward order.
LAYER_DIMS = [
    (129, 128), (128, 256), (256, 512), (512, 512),
    (512, 256), (256, 128), (128, 64),           # conv1..conv7 (+ReLU)
    (64, 64),                                    # fc1 (+ReLU)
    (64, 1),                                     # fc2 (no ReLU)
]


def _mlp_kernel(x_ref, *refs):
    """refs = (w1, b1, ..., w9, b9, out_ref).  Full chain on one batch tile.

    w1..w8: bf16 (C_in, C_out); b1..b8: f32 (1, C_out).
    w9: f32 row (1, 64); b9: f32 (1, 1).
    """
    out_ref = refs[-1]
    params = refs[:-1]
    n_layers = len(params) // 2

    h = x_ref[...].astype(jnp.float32)
    # conv1..conv7 + fc1: bf16 operands on the MXU, f32 accumulation,
    # bias add + ReLU on the f32 accumulator (VPU).
    for i in range(n_layers - 1):
        w = params[2 * i][...]                      # (C_in, C_out) bf16
        b = params[2 * i + 1][...]                  # (1, C_out) f32
        h = jnp.dot(h.astype(jnp.bfloat16), w,
                    preferred_element_type=jnp.float32)
        h = jnp.maximum(h + b, 0.0)
    # fc2 (64 -> 1): VPU multiply + lane reduction (avoids an N=1 MXU pass).
    w_last = params[-2][...]                        # (1, 64) f32
    b_last = params[-1][...]                        # (1, 1) f32
    y = jnp.sum(h * w_last, axis=-1, keepdims=True) + b_last
    out_ref[...] = y.astype(out_ref.dtype)


def init_params(key):
    """f32 params mimicking PyTorch default init:
    uniform(-1/sqrt(fan_in), 1/sqrt(fan_in)) for weight and bias.
    Weights are stored pre-transposed as (C_in, C_out)."""
    params = []
    for (c_in, c_out) in LAYER_DIMS:
        key, kw, kb = jax.random.split(key, 3)
        bound = 1.0 / math.sqrt(c_in)
        w = jax.random.uniform(kw, (c_in, c_out), jnp.float32, -bound, bound)
        b = jax.random.uniform(kb, (1, c_out), jnp.float32, -bound, bound)
        params.append((w, b))
    return params


def pack_params(params_f32):
    """Flatten params into the dtypes/layout the kernel consumes:
    bf16 weights + f32 biases for the matmul layers, final fc2 weight as an
    f32 row vector (1, 64) for the VPU reduction."""
    flat = []
    n = len(params_f32)
    for i, (w, b) in enumerate(params_f32):
        if i < n - 1:
            flat += [w.astype(jnp.bfloat16), b]
        else:
            flat += [jnp.transpose(w), b]           # (1, 64) f32, (1, 1) f32
    return flat


def _round_up(a, m):
    return ((a + m - 1) // m) * m


def _choose_batch_tile(B, tb):
    """Pick an 8-aligned batch tile.  Tiny batches -> one grid step (no per-step
    overhead); mid-sized batches -> 2 steps (v7x megacore); big -> `tb` tiles."""
    b8 = _round_up(max(B, 1), 8)
    if b8 >= 2 * tb:
        tb_eff = tb
    elif b8 >= 256:
        tb_eff = _round_up(-(-b8 // 2), 8)
    else:
        tb_eff = b8
    return tb_eff


@partial(jax.jit, static_argnames=("tb",))
def base_cnn_forward(x, flat_params, tb=256):
    """x: (B, 129) f32 -> (B, 1) f32.  tb = max batch tile (MXU M dimension)."""
    B, D = x.shape

    tb_eff = _choose_batch_tile(B, tb)
    Bp = _round_up(B, tb_eff)
    if Bp != B:
        x = jnp.pad(x, ((0, Bp - B), (0, 0)))
    grid = (Bp // tb_eff,)

    in_specs = [pl.BlockSpec((tb_eff, D), lambda i: (i, 0))]
    for p in flat_params:
        # Constant index_map => grid-invariant block: Pallas keeps the weights
        # resident and does not re-issue their DMA on every grid step.
        in_specs.append(pl.BlockSpec(p.shape, lambda i: (0, 0)))

    out = pl.pallas_call(
        _mlp_kernel,
        out_shape=jax.ShapeDtypeStruct((Bp, 1), jnp.float32),
        grid=grid,
        in_specs=in_specs,
        out_specs=pl.BlockSpec((tb_eff, 1), lambda i: (i, 0)),
        compiler_params=pltpu.CompilerParams(
            dimension_semantics=("parallel",),
            vmem_limit_bytes=32 * 1024 * 1024,   # raises v5e's 16 MiB default
        ),
    )(x, *flat_params)
    return out[:B]


def reference_forward(x, params_f32):
    """Pure-JAX reference mirroring the kernel's mixed precision
    (bf16 matmul operands, f32 accumulation / bias / ReLU)."""
    h = x.astype(jnp.float32)
    n = len(params_f32)
    for i, (w, b) in enumerate(params_f32):
        if i < n - 1:
            h = jnp.dot(h.astype(jnp.bfloat16), w.astype(jnp.bfloat16),
                        preferred_element_type=jnp.float32)
            h = jnp.maximum(h + b, 0.0)
        else:
            h = h @ w + b
    return h


if __name__ == "__main__":
    key = jax.random.PRNGKey(0)
    k_params, k_x = jax.random.split(key)

    params = init_params(k_params)
    flat_params = pack_params(params)

    B, input_dim = 50, 129           # small batch, deliberately not 8-aligned
    x = jax.random.normal(k_x, (B, input_dim), jnp.float32)

    out = base_cnn_forward(x, flat_params, tb=256)
    out = jax.block_until_ready(out)

    ref = reference_forward(x, params)
    assert out.shape == (B, 1)
    assert jnp.allclose(out, ref, atol=2e-3, rtol=2e-3), (
        "max abs err = %g" % float(jnp.max(jnp.abs(out - ref))))

    print("KERNEL_OK")
</pallas_src>

<mosaic_0001>
module attributes {stable_mosaic.version = 11 : i64} {
  func.func @_mlp_kernel(%arg0: i32, %arg1: memref<56x129xf32, #tpu.memory_space<vmem>>, %arg2: memref<129x128xbf16, #tpu.memory_space<vmem>>, %arg3: memref<1x128xf32, #tpu.memory_space<vmem>>, %arg4: memref<128x256xbf16, #tpu.memory_space<vmem>>, %arg5: memref<1x256xf32, #tpu.memory_space<vmem>>, %arg6: memref<256x512xbf16, #tpu.memory_space<vmem>>, %arg7: memref<1x512xf32, #tpu.memory_space<vmem>>, %arg8: memref<512x512xbf16, #tpu.memory_space<vmem>>, %arg9: memref<1x512xf32, #tpu.memory_space<vmem>>, %arg10: memref<512x256xbf16, #tpu.memory_space<vmem>>, %arg11: memref<1x256xf32, #tpu.memory_space<vmem>>, %arg12: memref<256x128xbf16, #tpu.memory_space<vmem>>, %arg13: memref<1x128xf32, #tpu.memory_space<vmem>>, %arg14: memref<128x64xbf16, #tpu.memory_space<vmem>>, %arg15: memref<1x64xf32, #tpu.memory_space<vmem>>, %arg16: memref<64x64xbf16, #tpu.memory_space<vmem>>, %arg17: memref<1x64xf32, #tpu.memory_space<vmem>>, %arg18: memref<1x64xf32, #tpu.memory_space<vmem>>, %arg19: memref<1x1xf32, #tpu.memory_space<vmem>>, %arg20: memref<56x1xf32, #tpu.memory_space<vmem>>) attributes {dimension_semantics = [#tpu.dimension_semantics<parallel>], iteration_bounds = array<i64: 1>, scalar_prefetch = 0 : i64, scratch_operands = 0 : i64, tpu.core_type = #tpu.core_type<tc>, window_params = [{transform_indices = @transform_0, window_bounds = array<i64: 56, 129>}, {pipeline_mode = #tpu.pipeline_mode<synchronous>, transform_indices = @transform_1, window_bounds = array<i64: 129, 128>}, {pipeline_mode = #tpu.pipeline_mode<synchronous>, transform_indices = @transform_2, window_bounds = array<i64: 1, 128>}, {pipeline_mode = #tpu.pipeline_mode<synchronous>, transform_indices = @transform_3, window_bounds = array<i64: 128, 256>}, {pipeline_mode = #tpu.pipeline_mode<synchronous>, transform_indices = @transform_4, window_bounds = array<i64: 1, 256>}, {pipeline_mode = #tpu.pipeline_mode<synchronous>, transform_indices = @transform_5, window_bounds = array<i64: 256, 512>}, {pipeline_mode = #tpu.pipeline_mode<synchronous>, transform_indices = @transform_6, window_bounds = array<i64: 1, 512>}, {pipeline_mode = #tpu.pipeline_mode<synchronous>, transform_indices = @transform_7, window_bounds = array<i64: 512, 512>}, {pipeline_mode = #tpu.pipeline_mode<synchronous>, transform_indices = @transform_8, window_bounds = array<i64: 1, 512>}, {pipeline_mode = #tpu.pipeline_mode<synchronous>, transform_indices = @transform_9, window_bounds = array<i64: 512, 256>}, {pipeline_mode = #tpu.pipeline_mode<synchronous>, transform_indices = @transform_10, window_bounds = array<i64: 1, 256>}, {pipeline_mode = #tpu.pipeline_mode<synchronous>, transform_indices = @transform_11, window_bounds = array<i64: 256, 128>}, {pipeline_mode = #tpu.pipeline_mode<synchronous>, transform_indices = @transform_12, window_bounds = array<i64: 1, 128>}, {pipeline_mode = #tpu.pipeline_mode<synchronous>, transform_indices = @transform_13, window_bounds = array<i64: 128, 64>}, {pipeline_mode = #tpu.pipeline_mode<synchronous>, transform_indices = @transform_14, window_bounds = array<i64: 1, 64>}, {pipeline_mode = #tpu.pipeline_mode<synchronous>, transform_indices = @transform_15, window_bounds = array<i64: 64, 64>}, {pipeline_mode = #tpu.pipeline_mode<synchronous>, transform_indices = @transform_16, window_bounds = array<i64: 1, 64>}, {pipeline_mode = #tpu.pipeline_mode<synchronous>, transform_indices = @transform_17, window_bounds = array<i64: 1, 64>}, {pipeline_mode = #tpu.pipeline_mode<synchronous>, transform_indices = @transform_18, window_bounds = array<i64: 1, 1>}, {transform_indices = @transform_19, window_bounds = array<i64: 56, 1>}]} {
    %c0 = arith.constant 0 : index
    %c0_0 = arith.constant 0 : index
    %0 = vector.load %arg1[%c0, %c0_0] : memref<56x129xf32, #tpu.memory_space<vmem>>, vector<56x129xf32>
    %c0_1 = arith.constant 0 : index
    %c0_2 = arith.constant 0 : index
    %1 = vector.load %arg2[%c0_1, %c0_2] : memref<129x128xbf16, #tpu.memory_space<vmem>>, vector<129x128xbf16>
    %c0_3 = arith.constant 0 : index
    %c0_4 = arith.constant 0 : index
    %2 = vector.load %arg3[%c0_3, %c0_4] : memref<1x128xf32, #tpu.memory_space<vmem>>, vector<1x128xf32>
    %3 = arith.truncf %0 : vector<56x129xf32> to vector<56x129xbf16>
    %cst = arith.constant dense<0.000000e+00> : vector<56x128xf32>
    %4 = tpu.matmul %3, %1, %cst {dimension_numbers = #tpu.dot_dimension_numbers<[1], [0], [0], [1], [0, 0, 1, 1], [], []>} : vector<56x129xbf16>, vector<129x128xbf16>, vector<56x128xf32> -> vector<56x128xf32>
    %5 = vector.broadcast %2 : vector<1x128xf32> to vector<56x128xf32>
    %6 = arith.addf %4, %5 : vector<56x128xf32>
    %cst_5 = arith.constant 0.000000e+00 : f32
    %7 = vector.broadcast %cst_5 : f32 to vector<56x128xf32>
    %8 = arith.maximumf %6, %7 : vector<56x128xf32>
    %c0_6 = arith.constant 0 : index
    %c0_7 = arith.constant 0 : index
    %9 = vector.load %arg4[%c0_6, %c0_7] : memref<128x256xbf16, #tpu.memory_space<vmem>>, vector<128x256xbf16>
    %c0_8 = arith.constant 0 : index
    %c0_9 = arith.constant 0 : index
    %10 = vector.load %arg5[%c0_8, %c0_9] : memref<1x256xf32, #tpu.memory_space<vmem>>, vector<1x256xf32>
    %11 = arith.truncf %8 : vector<56x128xf32> to vector<56x128xbf16>
    %cst_10 = arith.constant dense<0.000000e+00> : vector<56x256xf32>
    %12 = tpu.matmul %11, %9, %cst_10 {dimension_numbers = #tpu.dot_dimension_numbers<[1], [0], [0], [1], [0, 0, 1, 1], [], []>} : vector<56x128xbf16>, vector<128x256xbf16>, vector<56x256xf32> -> vector<56x256xf32>
    %13 = vector.broadcast %10 : vector<1x256xf32> to vector<56x256xf32>
    %14 = arith.addf %12, %13 : vector<56x256xf32>
    %cst_11 = arith.constant 0.000000e+00 : f32
    %15 = vector.broadcast %cst_11 : f32 to vector<56x256xf32>
    %16 = arith.maximumf %14, %15 : vector<56x256xf32>
    %c0_12 = arith.constant 0 : index
    %c0_13 = arith.constant 0 : index
    %17 = vector.load %arg6[%c0_12, %c0_13] : memref<256x512xbf16, #tpu.memory_space<vmem>>, vector<256x512xbf16>
    %c0_14 = arith.constant 0 : index
    %c0_15 = arith.constant 0 : index
    %18 = vector.load %arg7[%c0_14, %c0_15] : memref<1x512xf32, #tpu.memory_space<vmem>>, vector<1x512xf32>
    %19 = arith.truncf %16 : vector<56x256xf32> to vector<56x256xbf16>
    %cst_16 = arith.constant dense<0.000000e+00> : vector<56x512xf32>
    %20 = tpu.matmul %19, %17, %cst_16 {dimension_numbers = #tpu.dot_dimension_numbers<[1], [0], [0], [1], [0, 0, 1, 1], [], []>} : vector<56x256xbf16>, vector<256x512xbf16>, vector<56x512xf32> -> vector<56x512xf32>
    %21 = vector.broadcast %18 : vector<1x512xf32> to vector<56x512xf32>
    %22 = arith.addf %20, %21 : vector<56x512xf32>
    %cst_17 = arith.constant 0.000000e+00 : f32
    %23 = vector.broadcast %cst_17 : f32 to vector<56x512xf32>
    %24 = arith.maximumf %22, %23 : vector<56x512xf32>
    %c0_18 = arith.constant 0 : index
    %c0_19 = arith.constant 0 : index
    %25 = vector.load %arg8[%c0_18, %c0_19] : memref<512x512xbf16, #tpu.memory_space<vmem>>, vector<512x512xbf16>
    %c0_20 = arith.constant 0 : index
    %c0_21 = arith.constant 0 : index
    %26 = vector.load %arg9[%c0_20, %c0_21] : memref<1x512xf32, #tpu.memory_space<vmem>>, vector<1x512xf32>
    %27 = arith.truncf %24 : vector<56x512xf32> to vector<56x512xbf16>
    %cst_22 = arith.constant dense<0.000000e+00> : vector<56x512xf32>
    %28 = tpu.matmul %27, %25, %cst_22 {dimension_numbers = #tpu.dot_dimension_numbers<[1], [0], [0], [1], [0, 0, 1, 1], [], []>} : vector<56x512xbf16>, vector<512x512xbf16>, vector<56x512xf32> -> vector<56x512xf32>
    %29 = vector.broadcast %26 : vector<1x512xf32> to vector<56x512xf32>
    %30 = arith.addf %28, %29 : vector<56x512xf32>
    %cst_23 = arith.constant 0.000000e+00 : f32
    %31 = vector.broadcast %cst_23 : f32 to vector<56x512xf32>
    %32 = arith.maximumf %30, %31 : vector<56x512xf32>
    %c0_24 = arith.constant 0 : index
    %c0_25 = arith.constant 0 : index
    %33 = vector.load %arg10[%c0_24, %c0_25] : memref<512x256xbf16, #tpu.memory_space<vmem>>, vector<512x256xbf16>
    %c0_26 = arith.constant 0 : index
    %c0_27 = arith.constant 0 : index
    %34 = vector.load %arg11[%c0_26, %c0_27] : memref<1x256xf32, #tpu.memory_space<vmem>>, vector<1x256xf32>
    %35 = arith.truncf %32 : vector<56x512xf32> to vector<56x512xbf16>
    %cst_28 = arith.constant dense<0.000000e+00> : vector<56x256xf32>
    %36 = tpu.matmul %35, %33, %cst_28 {dimension_numbers = #tpu.dot_dimension_numbers<[1], [0], [0], [1], [0, 0, 1, 1], [], []>} : vector<56x512xbf16>, vector<512x256xbf16>, vector<56x256xf32> -> vector<56x256xf32>
    %37 = vector.broadcast %34 : vector<1x256xf32> to vector<56x256xf32>
    %38 = arith.addf %36, %37 : vector<56x256xf32>
    %cst_29 = arith.constant 0.000000e+00 : f32
    %39 = vector.broadcast %cst_29 : f32 to vector<56x256xf32>
    %40 = arith.maximumf %38, %39 : vector<56x256xf32>
    %c0_30 = arith.constant 0 : index
    %c0_31 = arith.constant 0 : index
    %41 = vector.load %arg12[%c0_30, %c0_31] : memref<256x128xbf16, #tpu.memory_space<vmem>>, vector<256x128xbf16>
    %c0_32 = arith.constant 0 : index
    %c0_33 = arith.constant 0 : index
    %42 = vector.load %arg13[%c0_32, %c0_33] : memref<1x128xf32, #tpu.memory_space<vmem>>, vector<1x128xf32>
    %43 = arith.truncf %40 : vector<56x256xf32> to vector<56x256xbf16>
    %cst_34 = arith.constant dense<0.000000e+00> : vector<56x128xf32>
    %44 = tpu.matmul %43, %41, %cst_34 {dimension_numbers = #tpu.dot_dimension_numbers<[1], [0], [0], [1], [0, 0, 1, 1], [], []>} : vector<56x256xbf16>, vector<256x128xbf16>, vector<56x128xf32> -> vector<56x128xf32>
    %45 = vector.broadcast %42 : vector<1x128xf32> to vector<56x128xf32>
    %46 = arith.addf %44, %45 : vector<56x128xf32>
    %cst_35 = arith.constant 0.000000e+00 : f32
    %47 = vector.broadcast %cst_35 : f32 to vector<56x128xf32>
    %48 = arith.maximumf %46, %47 : vector<56x128xf32>
    %c0_36 = arith.constant 0 : index
    %c0_37 = arith.constant 0 : index
    %49 = vector.load %arg14[%c0_36, %c0_37] : memref<128x64xbf16, #tpu.memory_space<vmem>>, vector<128x64xbf16>
    %c0_38 = arith.constant 0 : index
    %c0_39 = arith.constant 0 : index
    %50 = vector.load %arg15[%c0_38, %c0_39] : memref<1x64xf32, #tpu.memory_space<vmem>>, vector<1x64xf32>
    %51 = arith.truncf %48 : vector<56x128xf32> to vector<56x128xbf16>
    %cst_40 = arith.constant dense<0.000000e+00> : vector<56x64xf32>
    %52 = tpu.matmul %51, %49, %cst_40 {dimension_numbers = #tpu.dot_dimension_numbers<[1], [0], [0], [1], [0, 0, 1, 1], [], []>} : vector<56x128xbf16>, vector<128x64xbf16>, vector<56x64xf32> -> vector<56x64xf32>
    %53 = vector.broadcast %50 : vector<1x64xf32> to vector<56x64xf32>
    %54 = arith.addf %52, %53 : vector<56x64xf32>
    %cst_41 = arith.constant 0.000000e+00 : f32
    %55 = vector.broadcast %cst_41 : f32 to vector<56x64xf32>
    %56 = arith.maximumf %54, %55 : vector<56x64xf32>
    %c0_42 = arith.constant 0 : index
    %c0_43 = arith.constant 0 : index
    %57 = vector.load %arg16[%c0_42, %c0_43] : memref<64x64xbf16, #tpu.memory_space<vmem>>, vector<64x64xbf16>
    %c0_44 = arith.constant 0 : index
    %c0_45 = arith.constant 0 : index
    %58 = vector.load %arg17[%c0_44, %c0_45] : memref<1x64xf32, #tpu.memory_space<vmem>>, vector<1x64xf32>
    %59 = arith.truncf %56 : vector<56x64xf32> to vector<56x64xbf16>
    %cst_46 = arith.constant dense<0.000000e+00> : vector<56x64xf32>
    %60 = tpu.matmul %59, %57, %cst_46 {dimension_numbers = #tpu.dot_dimension_numbers<[1], [0], [0], [1], [0, 0, 1, 1], [], []>} : vector<56x64xbf16>, vector<64x64xbf16>, vector<56x64xf32> -> vector<56x64xf32>
    %61 = vector.broadcast %58 : vector<1x64xf32> to vector<56x64xf32>
    %62 = arith.addf %60, %61 : vector<56x64xf32>
    %cst_47 = arith.constant 0.000000e+00 : f32
    %63 = vector.broadcast %cst_47 : f32 to vector<56x64xf32>
    %64 = arith.maximumf %62, %63 : vector<56x64xf32>
    %c0_48 = arith.constant 0 : index
    %c0_49 = arith.constant 0 : index
    %65 = vector.load %arg18[%c0_48, %c0_49] : memref<1x64xf32, #tpu.memory_space<vmem>>, vector<1x64xf32>
    %c0_50 = arith.constant 0 : index
    %c0_51 = arith.constant 0 : index
    %66 = vector.load %arg19[%c0_50, %c0_51] : memref<1x1xf32, #tpu.memory_space<vmem>>, vector<1x1xf32>
    %67 = vector.broadcast %65 : vector<1x64xf32> to vector<56x64xf32>
    %68 = arith.mulf %64, %67 : vector<56x64xf32>
    %cst_52 = arith.constant dense<0.000000e+00> : vector<56xf32>
    %69 = vector.multi_reduction <add>, %68, %cst_52 [1] : vector<56x64xf32> to vector<56xf32>
    %70 = vector.shape_cast %69 : vector<56xf32> to vector<56x1xf32>
    %71 = vector.broadcast %66 : vector<1x1xf32> to vector<56x1xf32>
    %72 = arith.addf %70, %71 : vector<56x1xf32>
    %c0_53 = arith.constant 0 : index
    %c0_54 = arith.constant 0 : index
    %73 = vector.load %arg20[%c0_53, %c0_54] : memref<56x1xf32, #tpu.memory_space<vmem>>, vector<56x1xf32>
    tpu.vector_store %arg20[%c0_53, %c0_54], %72 {strides = array<i32>} : memref<56x1xf32, #tpu.memory_space<vmem>>, vector<56x1xf32>,
    return
  }
  func.func @transform_0(%arg0: i32) -> (i32, i32) {
    %c0_i32 = arith.constant 0 : i32
    %c0_i32_0 = arith.constant 0 : i32
    return %arg0, %c0_i32 : i32, i32
  }
  func.func @transform_1(%arg0: i32) -> (i32, i32) {
    %c0_i32 = arith.constant 0 : i32
    %c0_i32_0 = arith.constant 0 : i32
    %c0_i32_1 = arith.constant 0 : i32
    return %c0_i32, %c0_i32_0 : i32, i32
  }
  func.func @transform_2(%arg0: i32) -> (i32, i32) {
    %c0_i32 = arith.constant 0 : i32
    %c0_i32_0 = arith.constant 0 : i32
    %c0_i32_1 = arith.constant 0 : i32
    return %c0_i32, %c0_i32_0 : i32, i32
  }
  func.func @transform_3(%arg0: i32) -> (i32, i32) {
    %c0_i32 = arith.constant 0 : i32
    %c0_i32_0 = arith.constant 0 : i32
    %c0_i32_1 = arith.constant 0 : i32
    return %c0_i32, %c0_i32_0 : i32, i32
  }
  func.func @transform_4(%arg0: i32) -> (i32, i32) {
    %c0_i32 = arith.constant 0 : i32
    %c0_i32_0 = arith.constant 0 : i32
    %c0_i32_1 = arith.constant 0 : i32
    return %c0_i32, %c0_i32_0 : i32, i32
  }
  func.func @transform_5(%arg0: i32) -> (i32, i32) {
    %c0_i32 = arith.constant 0 : i32
    %c0_i32_0 = arith.constant 0 : i32
    %c0_i32_1 = arith.constant 0 : i32
    return %c0_i32, %c0_i32_0 : i32, i32
  }
  func.func @transform_6(%arg0: i32) -> (i32, i32) {
    %c0_i32 = arith.constant 0 : i32
    %c0_i32_0 = arith.constant 0 : i32
    %c0_i32_1 = arith.constant 0 : i32
    return %c0_i32, %c0_i32_0 : i32, i32
  }
  func.func @transform_7(%arg0: i32) -> (i32, i32) {
    %c0_i32 = arith.constant 0 : i32
    %c0_i32_0 = arith.constant 0 : i32
    %c0_i32_1 = arith.constant 0 : i32
    return %c0_i32, %c0_i32_0 : i32, i32
  }
  func.func @transform_8(%arg0: i32) -> (i32, i32) {
    %c0_i32 = arith.constant 0 : i32
    %c0_i32_0 = arith.constant 0 : i32
    %c0_i32_1 = arith.constant 0 : i32
    return %c0_i32, %c0_i32_0 : i32, i32
  }
  func.func @transform_9(%arg0: i32) -> (i32, i32) {
    %c0_i32 = arith.constant 0 : i32
    %c0_i32_0 = arith.constant 0 : i32
    %c0_i32_1 = arith.constant 0 : i32
    return %c0_i32, %c0_i32_0 : i32, i32
  }
  func.func @transform_10(%arg0: i32) -> (i32, i32) {
    %c0_i32 = arith.constant 0 : i32
    %c0_i32_0 = arith.constant 0 : i32
    %c0_i32_1 = arith.constant 0 : i32
    return %c0_i32, %c0_i32_0 : i32, i32
  }
  func.func @transform_11(%arg0: i32) -> (i32, i32) {
    %c0_i32 = arith.constant 0 : i32
    %c0_i32_0 = arith.constant 0 : i32
    %c0_i32_1 = arith.constant 0 : i32
    return %c0_i32, %c0_i32_0 : i32, i32
  }
  func.func @transform_12(%arg0: i32) -> (i32, i32) {
    %c0_i32 = arith.constant 0 : i32
    %c0_i32_0 = arith.constant 0 : i32
    %c0_i32_1 = arith.constant 0 : i32
    return %c0_i32, %c0_i32_0 : i32, i32
  }
  func.func @transform_13(%arg0: i32) -> (i32, i32) {
    %c0_i32 = arith.constant 0 : i32
    %c0_i32_0 = arith.constant 0 : i32
    %c0_i32_1 = arith.constant 0 : i32
    return %c0_i32, %c0_i32_0 : i32, i32
  }
  func.func @transform_14(%arg0: i32) -> (i32, i32) {
    %c0_i32 = arith.constant 0 : i32
    %c0_i32_0 = arith.constant 0 : i32
    %c0_i32_1 = arith.constant 0 : i32
    return %c0_i32, %c0_i32_0 : i32, i32
  }
  func.func @transform_15(%arg0: i32) -> (i32, i32) {
    %c0_i32 = arith.constant 0 : i32
    %c0_i32_0 = arith.constant 0 : i32
    %c0_i32_1 = arith.constant 0 : i32
    return %c0_i32, %c0_i32_0 : i32, i32
  }
  func.func @transform_16(%arg0: i32) -> (i32, i32) {
    %c0_i32 = arith.constant 0 : i32
    %c0_i32_0 = arith.constant 0 : i32
    %c0_i32_1 = arith.constant 0 : i32
    return %c0_i32, %c0_i32_0 : i32, i32
  }
  func.func @transform_17(%arg0: i32) -> (i32, i32) {
    %c0_i32 = arith.constant 0 : i32
    %c0_i32_0 = arith.constant 0 : i32
    %c0_i32_1 = arith.constant 0 : i32
    return %c0_i32, %c0_i32_0 : i32, i32
  }
  func.func @transform_18(%arg0: i32) -> (i32, i32) {
    %c0_i32 = arith.constant 0 : i32
    %c0_i32_0 = arith.constant 0 : i32
    %c0_i32_1 = arith.constant 0 : i32
    return %c0_i32, %c0_i32_0 : i32, i32
  }
  func.func @transform_19(%arg0: i32) -> (i32, i32) {
    %c0_i32 = arith.constant 0 : i32
    %c0_i32_0 = arith.constant 0 : i32
    return %arg0, %c0_i32 : i32, i32
  }
}

</mosaic_0001>

<bundles_post_ra>
// kernel: base_cnn_forward.1
= control target key start
LH: loop header
LB: loop body
LE: loop exit
PB: predicated region body
PF: predicated region fallthrough
CT: control target
= control target key end

     0   :  { %s4947_s0 = inlined_call_operand.vmem [shape: f32[56,129], index: 0, kind: input, shape index: {}]   ;;  %s4948_s1 = inlined_call_operand.vmem [shape: bf16[129,128], index: 1, kind: input, shape index: {}]   ;;  %s4949_s2 = inlined_call_operand.hbm [shape: f32[1,128], index: 2, kind: input, shape index: {}]   ;;  %s4950_s3 = inlined_call_operand.vmem [shape: bf16[128,256], index: 3, kind: input, shape index: {}]   ;;  %s4951_s4 = inlined_call_operand.hbm [shape: f32[1,256], index: 4, kind: input, shape index: {}]   ;;  %s4952_s5 = inlined_call_operand.hbm [shape: bf16[256,512], index: 5, kind: input, shape index: {}]   ;;  %s4953_s6 = inlined_call_operand.vmem [shape: f32[1,512], index: 6, kind: input, shape index: {}]   ;;  %s4954_s7 = inlined_call_operand.hbm [shape: bf16[512,512], index: 7, kind: input, shape index: {}]   ;;  %s4955_s8 = inlined_call_operand.vmem [shape: f32[1,512], index: 8, kind: input, shape index: {}]   ;;  %s4956_s9 = inlined_call_operand.hbm [shape: bf16[512,256], index: 9, kind: input, shape index: {}]   ;;  %s4957_s10 = inlined_call_operand.vmem [shape: f32[1,256], index: 10, kind: input, shape index: {}]   ;;  %s4958_s11 = inlined_call_operand.vmem [shape: bf16[256,128], index: 11, kind: input, shape index: {}]   ;;  %s4959_s12 = inlined_call_operand.vmem [shape: f32[1,128], index: 12, kind: input, shape index: {}]   ;;  %s4960_s13 = inlined_call_operand.vmem [shape: bf16[128,64], index: 13, kind: input, shape index: {}]   ;;  %s4961_s14 = inlined_call_operand.vmem [shape: f32[1,64], index: 14, kind: input, shape index: {}]   ;;  %s4962_s15 = inlined_call_operand.hbm [shape: bf16[64,64], index: 15, kind: input, shape index: {}]   ;;  %s4963_s16 = inlined_call_operand.vmem [shape: f32[1,64], index: 16, kind: input, shape index: {}]   ;;  %s4964_s17 = inlined_call_operand.vmem [shape: f32[1,64], index: 17, kind: input, shape index: {}]   ;;  %s4965_s18 = inlined_call_operand.<no memory space> [shape: f32[1,1], index: 18, kind: input, shape index: {}]   ;;  %s4966_s19 = inlined_call_operand.vmem [shape: f32[56,1], index: 19, kind: output, shape index: {}]  }
   0x1   :  { %4970 = sst [smem:[#allocation17_spill]] %s4947_s0  ;;  %v24_v0 = vstv %s4965_s18 }
   0x2   :  { %4971 = sst [smem:[#allocation18_spill]] %s4948_s1  ;;  %25 = vst [vmem:[#allocation2] sm:$0x1] %v24_v0 }
   0x3   :  { %4972 = sst [smem:[#allocation19_spill]] %s4949_s2 }
   0x4   :  { %4973 = sst [smem:[#allocation20_spill]] %s4950_s3 }
   0x5   :  { %26 = vsyncpa [#allocation4], 0 }
   0x6   :  { %27 = vsyncpa [#allocation6], 0 }
   0x7   :  { %28 = vsyncpa [#allocation9], 0 }
   0x8   :  { %29 = vsyncpa [#allocation12], 0  ;;  %s4357_s20 = smov [#allocation5]  }
   0x9   :  { %s52_s21 = sshll.u32 %s4357_s20, 4  ;;  %s53_s21 = int_to_ptr.vmem [resolvable:$true] %s52_s21 }
   0xa   :  { %s4237_s1 = scalar_lea.vmem %s53_s21, 32  ;;  %p4242_p1 = scmp.lt.s32.totalorder %s53_s21, %s53_s21 }
   0xb   :  { %p4238_p0 = scmp.ne.s32.totalorder %s53_s21, %s4237_s1  ;;  %p4243_p2 = scmp.lt.s32.totalorder %s4237_s1, %s4237_s1 }
   0xd   :  { %p4244_p3 = por %p4243_p2, %p4242_p1 }
   0xf   :  { %p4245_p4 = pnand %p4244_p3, %p4238_p0 }
  0x11   :  { %4248 = shalt.err (!%p4245_p4)
}
  0x12   :  { %55 = dma.hbm_to_vmem [thread:$0]  %s4951_s4, 32, %s53_s21, [#allocation6]  }
  0x13   :  { %s4358_s18 = smov [#allocation8]   ;;  %s4359_s24 = smov [#allocation3]  }
  0x14   :  { %s75_s23 = sshll.u32 %s4358_s18, 4  ;;  %s40_s25 = sshll.u32 %s4359_s24, 4  ;;  %s76_s23 = int_to_ptr.vmem [resolvable:$true] %s75_s23  ;;  %s41_s25 = int_to_ptr.vmem [resolvable:$true] %s40_s25 }
  0x15   :  { %s4257_s3 = scalar_lea.vmem %s76_s23, 16384  ;;  %p4262_p6 = scmp.lt.s32.totalorder %s76_s23, %s76_s23 }
  0x16   :  { %p4258_p5 = scmp.ne.s32.totalorder %s76_s23, %s4257_s3  ;;  %p4263_p7 = scmp.lt.s32.totalorder %s4257_s3, %s4257_s3 }
  0x18   :  { %p4264_p8 = por %p4263_p7, %p4262_p6 }
  0x1a   :  { %p4265_p9 = pnand %p4264_p8, %p4258_p5 }
  0x1c   :  { %4268 = shalt.err (!%p4265_p9)
}
  0x1d   :  { %s4360_s26 = smov 256   ;;  %s4361_s27 = smov 16  }
  0x1e   :  { %81 = dma.hbm_to_vmem [thread:$0]  %s4954_s7, 16384, %s76_s23, [#allocation9], %s4360_s26, %s4360_s26, %s4361_s27  }
  0x1f   :  { %s4277_s4 = scalar_lea.vmem %s41_s25, 16  ;;  %s4281_s0 = scalar_lea.vmem %s41_s25, 32 }
  0x20   :  { %p4278_p10 = scmp.ne.s32.totalorder %s41_s25, %s4277_s4  ;;  %p4282_p11 = scmp.lt.s32.totalorder %s41_s25, %s41_s25 }
  0x21   :  { %p4283_p12 = scmp.lt.s32.totalorder %s4281_s0, %s4277_s4 }
  0x23   :  { %p4284_p13 = por %p4283_p12, %p4282_p11 }
  0x25   :  { %p4285_p0 = pnand %p4284_p13, %p4278_p10 }
  0x27   :  { %4288 = shalt.err (!%p4285_p0)
}
  0x28   :  { %s4974_s21 = sld [smem:[#allocation19_spill]]  ;;  %s4362_s1 = smov [#allocation7]  }
  0x29   :  { %s61_s22 = sshll.u32 %s4362_s1, 4  ;;  %s4363_s2 = smov [#allocation10]   ;;  %s62_s22 = int_to_ptr.vmem [resolvable:$true] %s61_s22 }
  0x2a   :  { %s89_s18 = sshll.u32 %s4363_s2, 4  ;;  %s4297_s24 = scalar_lea.vmem %s62_s22, 8192  ;;  %s90_s18 = int_to_ptr.vmem [resolvable:$true] %s89_s18 }
  0x2b   :  { %p4298_p1 = scmp.ne.s32.totalorder %s62_s22, %s4297_s24  ;;  %p4302_p2 = scmp.lt.s32.totalorder %s62_s22, %s62_s22 }
  0x2c   :  { %p4303_p3 = scmp.lt.s32.totalorder %s4297_s24, %s4297_s24 }
  0x2e   :  { %43 = dma.hbm_to_vmem [thread:$0]  %s4974_s21, 16, %s41_s25, [#allocation4]  }
  0x2f   :  { %p4304_p4 = por %p4303_p3, %p4302_p2 }
  0x31   :  { %p4305_p5 = pnand %p4304_p4, %p4298_p1 }
  0x33   :  { %4308 = shalt.err (!%p4305_p5)
}
  0x34   :  { %67 = dma.hbm_to_vmem [thread:$0]  %s4952_s5, 8192, %s62_s22, [#allocation6], %s4360_s26, %s4360_s26, %s4361_s27  }
  0x35   :  { %s4317_s3 = scalar_lea.vmem %s90_s18, 8192  ;;  %p4322_p7 = scmp.lt.s32.totalorder %s90_s18, %s90_s18 }
  0x36   :  { %p4318_p6 = scmp.ne.s32.totalorder %s90_s18, %s4317_s3  ;;  %p4323_p8 = scmp.lt.s32.totalorder %s4317_s3, %s4317_s3 }
  0x38   :  { %p4324_p9 = por %p4323_p8, %p4322_p7 }
  0x3a   :  { %p4325_p10 = pnand %p4324_p9, %p4318_p6 }
  0x3c   :  { %4328 = shalt.err (!%p4325_p10)
}
  0x3d   :  { %s4364_s25 = smov 128   ;;  %s4365_s28 = smov 8  }
  0x3e   :  { %95 = dma.hbm_to_vmem [thread:$0]  %s4956_s9, 8192, %s90_s18, [#allocation9], %s4364_s25, %s4364_s25, %s4365_s28  }
  0x3f   :  { %s4366_s0 = smov [#allocation11]  }
  0x40   :  { %s111_s30 = sshll.u32 %s4366_s0, 4  ;;  %s112_s30 = int_to_ptr.vmem [resolvable:$true] %s111_s30 }
  0x41   :  { %s4337_s20 = scalar_lea.vmem %s112_s30, 512  ;;  %p4342_p12 = scmp.lt.s32.totalorder %s112_s30, %s112_s30 }
  0x42   :  { %p4338_p11 = scmp.ne.s32.totalorder %s112_s30, %s4337_s20  ;;  %p4343_p13 = scmp.lt.s32.totalorder %s4337_s20, %s4337_s20 }
  0x44   :  { %p4344_p0 = por %p4343_p13, %p4342_p12 }
  0x46   :  { %p4345_p1 = pnand %p4344_p0, %p4338_p11 }
  0x48   :  { %4348 = shalt.err (!%p4345_p1)
}
  0x49   :  { %s4367_s5 = smov 64   ;;  %s4368_s26 = smov 4  }
  0x4a   :  { %117 = dma.hbm_to_vmem [thread:$0]  %s4962_s15, 512, %s112_s30, [#allocation12], %s4367_s5, %s4367_s5, %s4368_s26  }
  0x4b   :  { %4349 = dma.done.wait [#allocation4], 16  }
  0x4c   :  { %4350 = vsyncadd [#allocation4], 4294967280 }
  0x4d   :  { %4351 = dma.done.wait [#allocation6], 8224  }
  0x4e   :  { %4352 = vsyncadd [#allocation6], 4294959072 }
  0x4f   :  { %4353 = dma.done.wait [#allocation9], 24576  }
  0x50   :  { %4354 = vsyncadd [#allocation9], 4294942720 }
  0x51   :  { %4355 = dma.done.wait [#allocation12], 512  }
  0x52   :  { %4356 = vsyncadd [#allocation12], 4294966784  ;;  %v4369_v1 = vmov 0   ;;  %s4975_s22 = sld [smem:[#allocation18_spill]]  ;;  %vm240_vm0 = vcmask 7168   ;;  %vm253_vm1 = vcmask 1040384  }
  0x53   :  { %259 = vmatprep.subr.bf16.mxu0 %v4369_v1  ;;  %474 = vmatprep.mubr.bf16.mxu1 %v4369_v1  ;;  %s4976_s3 = sld [smem:[#allocation17_spill]]  ;;  %v255_v23 = vsel %vm253_vm1, 65535, %v4369_v1  ;;  %v3819_v51 = vld [vmem:[#allocation7 + $0xe4] ss:$16 sps:$4 sm:$0xff]   ;;  %v3820_v52 = vld [vmem:[#allocation7 + $0xe8] ss:$16 sps:$4 sm:$0xff]  }
  0x54   :  { %s4977_s26 = sld [smem:[#allocation20_spill]]  ;;  %v3822_v53 = vld [vmem:[#allocation7 + $0xec] ss:$16 sps:$4 sm:$0xff]   ;;  %v3826_v55 = vld [vmem:[#allocation7 + $0xc8] ss:$16 sps:$4 sm:$0xff]   ;;  %vm3200_vm2 = vcmask 523264  }
  0x55   :  { %v3828_v54 = vld [vmem:[#allocation7 + $0xcc] ss:$16 sps:$4 sm:$0xff]   ;;  %v3832_v57 = vld [vmem:[#allocation7 + $0xa8] ss:$16 sps:$4 sm:$0xff]  }
  0x56   :  { %v3834_v56 = vld [vmem:[#allocation7 + $0xac] ss:$16 sps:$4 sm:$0xff]   ;;  %v3838_v59 = vld [vmem:[#allocation7 + $0x88] ss:$16 sps:$4 sm:$0xff]  }
  0x57   :  { %v3840_v58 = vld [vmem:[#allocation7 + $0x8c] ss:$16 sps:$4 sm:$0xff]   ;;  %v3844_v61 = vld [vmem:[#allocation7 + $0x68] ss:$16 sps:$4 sm:$0xff]  }
  0x58   :  { %v3784_v2 = vld [vmem:[%s4975_s22 + $0x38] sm:$0xff]   ;;  %v3785_v3 = vld [vmem:[%s4975_s22 + $0x30] sm:$0xff]   ;;  %v3786_v4 = vld [vmem:[%s4975_s22 + $0x28] sm:$0xff]  }
  0x59   :  { %260 = vmatpush1.bf16.msra.mxu0 %v3784_v2  ;;  %v144_v5 = vld [vmem:[%s4976_s3 + $0x8] sm:$0xff]  ;;  %v146_v6 = vld [vmem:[%s4976_s3 + $0x18] sm:$0xff]  ;;  %v3787_v7 = vld [vmem:[%s4975_s22 + $0x20] sm:$0xff]  }
  0x5a   :  { %261 = vmatprep.subr.bf16.mxu0 %v4369_v1  ;;  %v176_v8 = vpack.c.bf16 %v146_v6, %v144_v5  ;;  %v3788_v9 = vld [vmem:[%s4975_s22 + $0x18] sm:$0xff]   ;;  %v3796_v12 = vld [vmem:[%s4977_s26 + $0x64] ss:$8 sps:$4 sm:$0xff]   ;;  %v3798_v13 = vld [vmem:[%s4977_s26 + $0x60] ss:$8 sps:$4 sm:$0xff]  }
  0x5b   :  { %v3793_v10 = vld [vmem:[%s4977_s26 + $0x74] ss:$8 sps:$4 sm:$0xff]   ;;  %v3795_v11 = vld [vmem:[%s4977_s26 + $0x70] ss:$8 sps:$4 sm:$0xff]   ;;  %v3790_v16 = vld [vmem:[%s4975_s22 + $0x8] sm:$0xff]  }
  0x5c   :  { %3358 = vmatprep.mubr.msk.bf16.mxu0 %vm240_vm0, %v176_v8  ;;  %442 = vmatprep.subr.bf16.mxu1 %v3793_v10  ;;  %v3789_v14 = vld [vmem:[%s4975_s22 + $0x10] sm:$0xff]   ;;  %v3802_v18 = vld [vmem:[%s4977_s26 + $0x44] ss:$8 sps:$4 sm:$0xff]   ;;  %v3804_v19 = vld [vmem:[%s4977_s26 + $0x40] ss:$8 sps:$4 sm:$0xff]  }
  0x5d   :  { %262 = vmatpush1.bf16.msra.mxu0 %v3785_v3  ;;  %443 = vmatpush1.bf16.msra.mxu1 %v3795_v11  ;;  %v3799_v15 = vld [vmem:[%s4977_s26 + $0x54] ss:$8 sps:$4 sm:$0xff]   ;;  %v3801_v17 = vld [vmem:[%s4977_s26 + $0x50] ss:$8 sps:$4 sm:$0xff]   ;;  %v3791_v20 = vld [vmem:[%s4975_s22] sm:$0xff]  }
  0x5e   :  { %263 = vmatprep.subr.bf16.mxu0 %v4369_v1  ;;  %444 = vmatprep.subr.bf16.mxu1 %v3796_v12  ;;  %v3792_v21 = vld [vmem:[%s4975_s22 + $0x40] ss:$0 sps:$4 sm:$0x11]   ;;  %v3805_v22 = vld [vmem:[%s4977_s26 + $0x34] ss:$8 sps:$4 sm:$0xff]   ;;  %v148_v28 = vld [vmem:[%s4976_s3 + $0x28] sm:$0xff] }
  0x5f   :  { %v3807_v24 = vld [vmem:[%s4977_s26 + $0x30] ss:$8 sps:$4 sm:$0xff]   ;;  %v143_v25 = vld [vmem:[%s4976_s3] sm:$0xff]  ;;  %v257_v30 = vand.u32 %v3792_v21, %v255_v23  ;;  %v152_v35 = vld [vmem:[%s4976_s3 + $0x48] sm:$0xff] }
  0x60   :  { %v145_v26 = vld [vmem:[%s4976_s3 + $0x10] sm:$0xff]  ;;  %v3808_v27 = vld [vmem:[%s4977_s26 + $0x24] ss:$8 sps:$4 sm:$0xff]   ;;  %v150_v29 = vld [vmem:[%s4976_s3 + $0x38] sm:$0xff] }
  0x61   :  { %264 = vmatpush1.bf16.msra.mxu0 %v3786_v4  ;;  %445 = vmatpush1.bf16.msra.mxu1 %v3798_v13  ;;  %v175_v31 = vpack.c.bf16 %v145_v26, %v143_v25  ;;  %v178_v32 = vpack.c.bf16 %v150_v29, %v148_v28  ;;  %v147_v33 = vld [vmem:[%s4976_s3 + $0x20] sm:$0xff]  ;;  %v149_v34 = vld [vmem:[%s4976_s3 + $0x30] sm:$0xff]  ;;  %v154_v36 = vld [vmem:[%s4976_s3 + $0x58] sm:$0xff] }
  0x62   :  { %265 = vmatprep.subr.bf16.mxu0 %v4369_v1  ;;  %446 = vmatprep.subr.bf16.mxu1 %v3799_v15  ;;  %v177_v37 = vpack.c.bf16 %v149_v34, %v147_v33  ;;  %v180_v38 = vpack.c.bf16 %v154_v36, %v152_v35  ;;  %v151_v39 = vld [vmem:[%s4976_s3 + $0x40] sm:$0xff]  ;;  %v153_v40 = vld [vmem:[%s4976_s3 + $0x50] sm:$0xff]  ;;  %v156_v41 = vld [vmem:[%s4976_s3 + $0x68] sm:$0xff] }
  0x63   :  { %v179_v42 = vpack.c.bf16 %v153_v40, %v151_v39  ;;  %v182_v43 = vpack.c.bf16 %v156_v41, %v156_v41  ;;  %v155_v44 = vld [vmem:[%s4976_s3 + $0x60] sm:$0xff]  ;;  %v3811_v47 = vld [vmem:[%s4977_s26 + $0x14] ss:$8 sps:$4 sm:$0xff]   ;;  %v3813_v48 = vld [vmem:[%s4977_s26 + $0x10] ss:$8 sps:$4 sm:$0xff]  }
  0x64   :  { %v181_v45 = vpack.c.bf16 %v155_v44, %v155_v44  ;;  %v3810_v46 = vld [vmem:[%s4977_s26 + $0x20] ss:$8 sps:$4 sm:$0xff]   ;;  %v3814_v49 = vld [vmem:[%s4977_s26 + $0x4] ss:$8 sps:$4 sm:$0xff]  }
  0x65   :  { %266 = vmatpush1.bf16.msra.mxu0 %v3787_v7  ;;  %447 = vmatpush1.bf16.msra.mxu1 %v3801_v17  ;;  %v3816_v50 = vld [vmem:[%s4977_s26] ss:$8 sps:$4 sm:$0xff]  }
  0x66   :  { %267 = vmatprep.subr.bf16.mxu0 %v4369_v1  ;;  %448 = vmatprep.subr.bf16.mxu1 %v3802_v18  ;;  %v3846_v60 = vld [vmem:[#allocation7 + $0x6c] ss:$16 sps:$4 sm:$0xff]   ;;  %v3850_v63 = vld [vmem:[#allocation7 + $0x48] ss:$16 sps:$4 sm:$0xff]   ;;  %v3817_v25 = vld [vmem:[#allocation7 + $0xe0] ss:$16 sps:$4 sm:$0xff]  }
  0x67   :  { %v3852_v62 = vld [vmem:[#allocation7 + $0x4c] ss:$16 sps:$4 sm:$0xff]   ;;  %v3856_v2 = vld [vmem:[#allocation7 + $0x28] ss:$16 sps:$4 sm:$0xff]   ;;  %v3825_v28 = vld [vmem:[#allocation7 + $0xc4] ss:$16 sps:$4 sm:$0xff]  }
  0x68   :  { %v3858_v0 = vld [vmem:[#allocation7 + $0x2c] ss:$16 sps:$4 sm:$0xff]   ;;  %v3862_v4 = vld [vmem:[#allocation7 + $0x8] ss:$16 sps:$4 sm:$0xff]   ;;  %v3831_v34 = vld [vmem:[#allocation7 + $0xa4] ss:$16 sps:$4 sm:$0xff]  }
  0x69   :  { %268 = vmatpush1.bf16.msra.mxu0 %v3788_v9  ;;  %449 = vmatpush1.bf16.msra.mxu1 %v3804_v19  ;;  %v3864_v3 = vld [vmem:[#allocation7 + $0xc] ss:$16 sps:$4 sm:$0xff]   ;;  %v3868_v6 = vld [vmem:[#allocation7 + $0x1e8] ss:$16 sps:$4 sm:$0xff]   ;;  %v3837_v41 = vld [vmem:[#allocation7 + $0x84] ss:$16 sps:$4 sm:$0xff]  }
  0x6a   :  { %269 = vmatprep.subr.bf16.mxu0 %v4369_v1  ;;  %450 = vmatprep.subr.bf16.mxu1 %v3805_v22  ;;  %v3870_v5 = vld [vmem:[#allocation7 + $0x1ec] ss:$16 sps:$4 sm:$0xff]   ;;  %v3874_v8 = vld [vmem:[#allocation7 + $0x1c8] ss:$16 sps:$4 sm:$0xff]   ;;  %v3835_v44 = vld [vmem:[#allocation7 + $0x80] ss:$16 sps:$4 sm:$0xff]  }
  0x6b   :  { %v3876_v7 = vld [vmem:[#allocation7 + $0x1cc] ss:$16 sps:$4 sm:$0xff]   ;;  %v3880_v10 = vld [vmem:[#allocation7 + $0x1a8] ss:$16 sps:$4 sm:$0xff]  }
  0x6c   :  { %v3882_v9 = vld [vmem:[#allocation7 + $0x1ac] ss:$16 sps:$4 sm:$0xff]   ;;  %v3886_v12 = vld [vmem:[#allocation7 + $0x188] ss:$16 sps:$4 sm:$0xff]  }
  0x6d   :  { %270 = vmatpush1.bf16.msra.mxu0 %v3789_v14  ;;  %451 = vmatpush1.bf16.msra.mxu1 %v3807_v24  ;;  %v3888_v11 = vld [vmem:[#allocation7 + $0x18c] ss:$16 sps:$4 sm:$0xff]   ;;  %v3892_v14 = vld [vmem:[#allocation7 + $0x168] ss:$16 sps:$4 sm:$0xff]  }
  0x6e   :  { %271 = vmatprep.subr.bf16.mxu0 %v4369_v1  ;;  %452 = vmatprep.subr.bf16.mxu1 %v3808_v27  ;;  %v3894_v13 = vld [vmem:[#allocation7 + $0x16c] ss:$16 sps:$4 sm:$0xff]  }
  0x6f   :  { %v3348_v15 = vld [vmem:[#allocation3] ss:$0 sm:$0xff] }
  0x71   :  { %272 = vmatpush1.bf16.msra.mxu0 %v3790_v16  ;;  %453 = vmatpush1.bf16.msra.mxu1 %v3810_v46 }
  0x72   :  { %273 = vmatprep.subr.bf16.mxu0 %v4369_v1  ;;  %454 = vmatprep.subr.bf16.mxu1 %v3811_v47  ;;  %v3843_v47 = vld [vmem:[#allocation7 + $0x64] ss:$16 sps:$4 sm:$0xff]  }
  0x75   :  { %274 = vmatpush1.bf16.msra.mxu0 %v3791_v20  ;;  %455 = vmatpush1.bf16.msra.mxu1 %v3813_v48 }
  0x76   :  { %289 = vmatprep.subr.bf16.mxu0 %v4369_v1  ;;  %456 = vmatprep.subr.bf16.mxu1 %v3814_v49 }
  0x79   :  { %290 = vmatpush2.bf16.msra.mxu0 %v257_v30  ;;  %457 = vmatpush1.bf16.msra.mxu1 %v3816_v50 }
  0x7a   :  { %941 = vmatprep.subr.bf16.mxu1 %v3819_v51  ;;  %1012 = vmatprep.subr.bf16.mxu0 %v3822_v53  ;;  %v3841_v51 = vld [vmem:[#allocation7 + $0x60] ss:$16 sps:$4 sm:$0xff]  }
  0x7c   :  { %292 = vmatmul.mubr.bf16.vlgmr.msra.gmra.mxu0 %v175_v31  ;;  %v3823_v31 = vld [vmem:[#allocation7 + $0xc0] ss:$16 sps:$4 sm:$0xff]  }
  0x7d   :  { %3359 = vmatprep.mubr.msk.bf16.mxu0 %vm240_vm0, %v178_v32  ;;  %1013 = vmatpush1.bf16.msra.mxu0 %v3820_v52 }
  0x7e   :  { %1014 = vmatprep.subr.bf16.mxu0 %v3828_v54  ;;  %v3849_v54 = vld [vmem:[#allocation7 + $0x44] ss:$16 sps:$4 sm:$0xff]  }
  0x81   :  { %1015 = vmatpush1.bf16.msra.mxu0 %v3826_v55 }
  0x82   :  { %1016 = vmatprep.subr.bf16.mxu0 %v3834_v56 }
  0x84   :  { %300 = vmatmul.mubr.bf16.gmra.mxu0 %v177_v37 }
  0x85   :  { %3360 = vmatprep.mubr.msk.bf16.mxu0 %vm240_vm0, %v180_v38  ;;  %1017 = vmatpush1.bf16.msra.mxu0 %v3832_v57  ;;  %v3829_v38 = vld [vmem:[#allocation7 + $0xa0] ss:$16 sps:$4 sm:$0xff]  }
  0x86   :  { %1018 = vmatprep.subr.bf16.mxu0 %v3840_v58  ;;  %v3847_v58 = vld [vmem:[#allocation7 + $0x40] ss:$16 sps:$4 sm:$0xff]  }
  0x89   :  { %1019 = vmatpush1.bf16.msra.mxu0 %v3838_v59  ;;  %v3855_v59 = vld [vmem:[#allocation7 + $0x24] ss:$16 sps:$4 sm:$0xff]  }
  0x8a   :  { %1020 = vmatprep.subr.bf16.mxu0 %v3846_v60 }
  0x8c   :  { %308 = vmatmul.mubr.bf16.gmra.mxu0 %v179_v42 }
  0x8d   :  { %3361 = vmatprep.mubr.msk.bf16.mxu0 %vm240_vm0, %v182_v43  ;;  %1021 = vmatpush1.bf16.msra.mxu0 %v3844_v61 }
  0x8e   :  { %1022 = vmatprep.subr.bf16.mxu0 %v3852_v62  ;;  %v3853_v62 = vld [vmem:[#allocation7 + $0x20] ss:$16 sps:$4 sm:$0xff]  }
  0x91   :  { %1023 = vmatpush1.bf16.msra.mxu0 %v3850_v63  ;;  %v3861_v63 = vld [vmem:[#allocation7 + $0x4] ss:$16 sps:$4 sm:$0xff]  }
  0x92   :  { %1024 = vmatprep.subr.bf16.mxu0 %v3858_v0  ;;  %v3859_v0 = vld [vmem:[#allocation7] ss:$16 sps:$4 sm:$0xff]  }
  0x94   :  { %316 = vmatmul.mubr.bf16.gmra.mxu0 %v181_v45 }
  0x95   :  { %1025 = vmatpush1.bf16.msra.mxu0 %v3856_v2  ;;  %v3867_v2 = vld [vmem:[#allocation7 + $0x1e4] ss:$16 sps:$4 sm:$0xff]  }
  0x96   :  { %1026 = vmatprep.subr.bf16.mxu0 %v3864_v3  ;;  %v3865_v3 = vld [vmem:[#allocation7 + $0x1e0] ss:$16 sps:$4 sm:$0xff]  }
  0x99   :  { %1027 = vmatpush1.bf16.msra.mxu0 %v3862_v4  ;;  %v3871_v4 = vld [vmem:[#allocation7 + $0x1c0] ss:$16 sps:$4 sm:$0xff]  }
  0x9a   :  { %1028 = vmatprep.subr.bf16.mxu0 %v3870_v5  ;;  %v3879_v5 = vld [vmem:[#allocation7 + $0x1a4] ss:$16 sps:$4 sm:$0xff]  }
  0x9d   :  { %1029 = vmatpush2.bf16.msra.mxu0 %v3868_v6  ;;  %v3877_v6 = vld [vmem:[#allocation7 + $0x1a0] ss:$16 sps:$4 sm:$0xff]  }
  0x9e   :  { %1030 = vmatprep.subr.bf16.mxu0 %v3876_v7  ;;  %v3885_v7 = vld [vmem:[#allocation7 + $0x184] ss:$16 sps:$4 sm:$0xff]  }
  0xa1   :  { %1031 = vmatpush2.bf16.msra.mxu0 %v3874_v8  ;;  %v3883_v8 = vld [vmem:[#allocation7 + $0x180] ss:$16 sps:$4 sm:$0xff]  }
  0xa2   :  { %1032 = vmatprep.subr.bf16.mxu0 %v3882_v9  ;;  %v3891_v9 = vld [vmem:[#allocation7 + $0x164] ss:$16 sps:$4 sm:$0xff]  }
  0xa5   :  { %1033 = vmatpush2.bf16.msra.mxu0 %v3880_v10  ;;  %v3889_v10 = vld [vmem:[#allocation7 + $0x160] ss:$16 sps:$4 sm:$0xff]  }
  0xa6   :  { %1034 = vmatprep.subr.bf16.mxu0 %v3888_v11  ;;  %v3897_v11 = vld [vmem:[#allocation7 + $0x144] ss:$16 sps:$4 sm:$0xff]  }
  0xa9   :  { %1035 = vmatpush2.bf16.msra.mxu0 %v3886_v12  ;;  %v3900_v12 = vld [vmem:[#allocation7 + $0x14c] ss:$16 sps:$4 sm:$0xff]  }
  0xaa   :  { %1036 = vmatprep.subr.bf16.mxu0 %v3894_v13  ;;  %v3895_v13 = vld [vmem:[#allocation7 + $0x140] ss:$16 sps:$4 sm:$0xff]  }
  0xad   :  { %1037 = vmatpush2.bf16.msra.mxu0 %v3892_v14  ;;  %v3898_v14 = vld [vmem:[#allocation7 + $0x148] ss:$16 sps:$4 sm:$0xff]  }
  0xae   :  { %1038 = vmatprep.subr.bf16.mxu0 %v3900_v12  ;;  %v3936_v12 = vld [vmem:[#allocation8 + $0x284] ss:$16 sps:$4 sm:$0xff]  }
  0xb1   :  { %1039 = vmatpush2.bf16.msra.mxu0 %v3898_v14 }
 0x13c   :  { %v293_v16 = vpop.f32.mrf.mxu0 }
 0x13d   :  { %v294_v18 = vadd.f32 %v3348_v15, %v293_v16  ;;  %v3906_v16 = vld [vmem:[#allocation7 + $0x12c] ss:$16 sps:$4 sm:$0xff]  }
 0x13e   :  { %v295_v17 = vpop.f32.mrf.mxu0  ;;  %1040 = vmatprep.subr.bf16.mxu0 %v3906_v16 }
 0x13f   :  { %v323_v22 = vmax.f32 %v294_v18, 0.0  ;;  %v3901_v17 = vld [vmem:[#allocation7 + $0x120] ss:$16 sps:$4 sm:$0xff]   ;;  %v3904_v18 = vld [vmem:[#allocation7 + $0x128] ss:$16 sps:$4 sm:$0xff]  }
 0x140   :  { %v296_v19 = vpop.f32.mrf.mxu0  ;;  %1041 = vmatpush2.bf16.msra.mxu0 %v3904_v18 }
 0x141   :  { %v297_v20 = vadd.f32 %v3348_v15, %v296_v19  ;;  %v3909_v19 = vld [vmem:[#allocation7 + $0x104] ss:$16 sps:$4 sm:$0xff]  }
 0x142   :  { %v298_v21 = vpop.f32.mrf.mxu0 }
 0x143   :  { %v324_v23 = vmax.f32 %v297_v20, 0.0  ;;  %v3912_v20 = vld [vmem:[#allocation7 + $0x10c] ss:$16 sps:$4 sm:$0xff]   ;;  %v3907_v21 = vld [vmem:[#allocation7 + $0x100] ss:$16 sps:$4 sm:$0xff]  }
 0x144   :  { %v301_v24 = vpop.f32.mrf.mxu0  ;;  %1042 = vmatprep.subr.bf16.mxu0 %v3912_v20  ;;  %v3934_v20 = vld [vmem:[#allocation8 + $0x280] ss:$16 sps:$4 sm:$0xff]  }
 0x145   :  { %v347_v26 = vpack.c.bf16 %v324_v23, %v323_v22  ;;  %v302_v27 = vadd.f32 %v3348_v15, %v301_v24  ;;  %v3910_v22 = vld [vmem:[#allocation7 + $0x108] ss:$16 sps:$4 sm:$0xff]   ;;  %v3915_v23 = vld [vmem:[#allocation8 + $0xe4] ss:$16 sps:$4 sm:$0xff]  }
 0x146   :  { %v303_v29 = vpop.f32.mrf.mxu0  ;;  %1043 = vmatpush2.bf16.msra.mxu0 %v3910_v22  ;;  %v3918_v24 = vld [vmem:[#allocation8 + $0x2e4] ss:$16 sps:$4 sm:$0xff]  }
 0x147   :  { %475 = vmatmul.mubr.bf16.vlgmr.msra.gmra.mxu1 %v347_v26  ;;  %v325_v32 = vmax.f32 %v302_v27, 0.0  ;;  %1988 = vmatprep.subr.bf16.mxu0 %v3918_v24  ;;  %v346_v29 = vld [vmem:[#allocation5] sm:$0x3]  ;;  %v3939_v22 = vld [vmem:[#allocation8 + $0x64] ss:$16 sps:$4 sm:$0xff]  }
 0x148   :  { %v304_v30 = vpop.f32.mrf.mxu0  ;;  %484 = vmatprep.mubr.bf16.mxu1 %v4369_v1  ;;  %942 = vmatpush1.bf16.msra.mxu1 %v3817_v25  ;;  %v352_v25 = vlaneseq }
 0x149   :  { %v305_v33 = vadd.f32 %v3348_v15, %v304_v30  ;;  %943 = vmatprep.subr.bf16.mxu1 %v3825_v28 }
 0x14a   :  { %v306_v35 = vpop.f32.mrf.mxu0  ;;  %v4626_v26 = vshrl.u32 %v352_v25, 7 }
 0x14b   :  { %v326_v36 = vmax.f32 %v305_v33, 0.0 }
 0x14c   :  { %v309_v37 = vpop.f32.mrf.mxu0  ;;  %944 = vmatpush1.bf16.msra.mxu1 %v3823_v31  ;;  %v4629_v27 = vsub.s32 1, %v4626_v26  ;;  %v4632_v28 = vsub.s32 0, %v4626_v26 }
 0x14d   :  { %v348_v39 = vpack.c.bf16 %v326_v36, %v325_v32  ;;  %v310_v40 = vadd.f32 %v3348_v15, %v309_v37  ;;  %945 = vmatprep.subr.bf16.mxu1 %v3831_v34 }
 0x14e   :  { %v311_v42 = vpop.f32.mrf.mxu0  ;;  %v4635_v31 = vrot.slane %v346_v29, %v4629_v27  ;;  %v4638_v32 = vrot.slane %v346_v29, %v4632_v28 }
 0x14f   :  { %485 = vmatmul.mubr.bf16.gmra.mxu1 %v348_v39  ;;  %v327_v45 = vmax.f32 %v310_v40, 0.0 }
 0x150   :  { %v312_v43 = vpop.f32.mrf.mxu0  ;;  %494 = vmatprep.mubr.bf16.mxu1 %v4369_v1  ;;  %946 = vmatpush1.bf16.msra.mxu1 %v3829_v38 }
 0x151   :  { %v313_v46 = vadd.f32 %v3348_v15, %v312_v43  ;;  %947 = vmatprep.subr.bf16.mxu1 %v3837_v41 }
 0x152   :  { %v314_v48 = vpop.f32.mrf.mxu0 }
 0x153   :  { %v328_v49 = vmax.f32 %v313_v46, 0.0 }
 0x154   :  { %v317_v50 = vpop.f32.mrf.mxu0  ;;  %948 = vmatpush1.bf16.msra.mxu1 %v3835_v44 }
 0x155   :  { %v349_v52 = vpack.c.bf16 %v328_v49, %v327_v45  ;;  %v318_v53 = vadd.f32 %v3348_v15, %v317_v50  ;;  %949 = vmatprep.subr.bf16.mxu1 %v3843_v47  ;;  %v3903_v15 = vld [vmem:[#allocation7 + $0x124] ss:$16 sps:$4 sm:$0xff]   ;;  %v3913_v49 = vld [vmem:[#allocation8 + $0xe0] ss:$16 sps:$4 sm:$0xff]  }
 0x156   :  { %v319_v55 = vpop.f32.mrf.mxu0  ;;  %v3916_v50 = vld [vmem:[#allocation8 + $0x2e0] ss:$16 sps:$4 sm:$0xff]  }
 0x157   :  { %495 = vmatmul.mubr.bf16.gmra.mxu1 %v349_v52  ;;  %v329_v56 = vmax.f32 %v318_v53, 0.0  ;;  %v3921_v53 = vld [vmem:[#allocation8 + $0xc4] ss:$16 sps:$4 sm:$0xff]  }
 0x158   :  { %504 = vmatprep.mubr.bf16.mxu1 %v4369_v1  ;;  %v320_v57 = vpop.f32.mrf.mxu0  ;;  %950 = vmatpush1.bf16.msra.mxu1 %v3841_v51  ;;  %v3873_v1 = vld [vmem:[#allocation7 + $0x1c4] ss:$16 sps:$4 sm:$0xff]  }
 0x159   :  { %951 = vmatprep.subr.bf16.mxu1 %v3849_v54  ;;  %v350_v61 = vpack.c.bf16 %v329_v56, %v329_v56  ;;  %v3924_v54 = vld [vmem:[#allocation8 + $0x2c4] ss:$16 sps:$4 sm:$0xff]  }
 0x15a   :  { %v321_v60 = vpop.f32.mrf.mxu0 }
 0x15c   :  { %952 = vmatpush1.bf16.msra.mxu1 %v3847_v58 }
 0x15d   :  { %953 = vmatprep.subr.bf16.mxu1 %v3855_v59 }
 0x15f   :  { %505 = vmatmul.mubr.bf16.gmra.mxu1 %v350_v61  ;;  %v3919_v61 = vld [vmem:[#allocation8 + $0xc0] ss:$16 sps:$4 sm:$0xff]  }
 0x160   :  { %954 = vmatpush1.bf16.msra.mxu1 %v3853_v62  ;;  %v3922_v62 = vld [vmem:[#allocation8 + $0x2c0] ss:$16 sps:$4 sm:$0xff]  }
 0x161   :  { %955 = vmatprep.subr.bf16.mxu1 %v3861_v63 }
 0x164   :  { %956 = vmatpush1.bf16.msra.mxu1 %v3859_v0  ;;  %v3927_v0 = vld [vmem:[#allocation8 + $0xa4] ss:$16 sps:$4 sm:$0xff]  }
 0x165   :  { %957 = vmatprep.subr.bf16.mxu1 %v3867_v2  ;;  %v3930_v2 = vld [vmem:[#allocation8 + $0x2a4] ss:$16 sps:$4 sm:$0xff]  }
 0x168   :  { %958 = vmatpush2.bf16.msra.mxu1 %v3865_v3 }
 0x169   :  { %959 = vmatprep.subr.bf16.mxu1 %v3873_v1 }
 0x16c   :  { %960 = vmatpush2.bf16.msra.mxu1 %v3871_v4 }
 0x16d   :  { %961 = vmatprep.subr.bf16.mxu1 %v3879_v5 }
 0x170   :  { %962 = vmatpush2.bf16.msra.mxu1 %v3877_v6 }
 0x171   :  { %963 = vmatprep.subr.bf16.mxu1 %v3885_v7 }
 0x174   :  { %964 = vmatpush2.bf16.msra.mxu1 %v3883_v8  ;;  %v3925_v8 = vld [vmem:[#allocation8 + $0xa0] ss:$16 sps:$4 sm:$0xff]  }
 0x175   :  { %965 = vmatprep.subr.bf16.mxu1 %v3891_v9  ;;  %v3928_v9 = vld [vmem:[#allocation8 + $0x2a0] ss:$16 sps:$4 sm:$0xff]  }
 0x178   :  { %966 = vmatpush2.bf16.msra.mxu1 %v3889_v10 }
 0x179   :  { %967 = vmatprep.subr.bf16.mxu1 %v3897_v11  ;;  %v3933_v11 = vld [vmem:[#allocation8 + $0x84] ss:$16 sps:$4 sm:$0xff]  }
 0x17c   :  { %968 = vmatpush2.bf16.msra.mxu1 %v3895_v13 }
 0x17d   :  { %969 = vmatprep.subr.bf16.mxu1 %v3903_v15 }
 0x180   :  { %970 = vmatpush2.bf16.msra.mxu1 %v3901_v17 }
 0x181   :  { %971 = vmatprep.subr.bf16.mxu1 %v3909_v19  ;;  %v3931_v19 = vld [vmem:[#allocation8 + $0x80] ss:$16 sps:$4 sm:$0xff]  }
 0x184   :  { %972 = vmatpush2.bf16.msra.mxu1 %v3907_v21 }
 0x185   :  { %1917 = vmatprep.subr.bf16.mxu1 %v3915_v23  ;;  %v3942_v23 = vld [vmem:[#allocation8 + $0x264] ss:$16 sps:$4 sm:$0xff]  }
 0x207   :  { %v476_v30 = vpop.f32.mrf.mxu1 }
 0x208   :  { %v477_v37 = vadd.f32 %v476_v30, %v4638_v32 }
 0x209   :  { %v478_v33 = vpop.f32.mrf.mxu1 }
 0x20a   :  { %v479_v35 = vadd.f32 %v478_v33, %v4635_v31  ;;  %v513_v44 = vmax.f32 %v477_v37, 0.0 }
 0x20b   :  { %v480_v34 = vpop.f32.mrf.mxu1 }
 0x20c   :  { %v481_v36 = vadd.f32 %v480_v34, %v4638_v32  ;;  %v514_v42 = vmax.f32 %v479_v35, 0.0  ;;  %v3937_v35 = vld [vmem:[#allocation8 + $0x60] ss:$16 sps:$4 sm:$0xff]  }
 0x20d   :  { %v482_v38 = vpop.f32.mrf.mxu1 }
 0x20e   :  { %v483_v39 = vadd.f32 %v482_v38, %v4635_v31  ;;  %v515_v40 = vmax.f32 %v481_v36, 0.0  ;;  %v3940_v36 = vld [vmem:[#allocation8 + $0x260] ss:$16 sps:$4 sm:$0xff]   ;;  %v3945_v38 = vld [vmem:[#allocation8 + $0x44] ss:$16 sps:$4 sm:$0xff]  }
 0x20f   :  { %v486_v41 = vpop.f32.mrf.mxu1 }
 0x210   :  { %v516_v43 = vmax.f32 %v483_v39, 0.0  ;;  %v487_v45 = vadd.f32 %v486_v41, %v4638_v32  ;;  %v592_v51 = vpack.c.bf16 %v515_v40, %v513_v44  ;;  %v3948_v39 = vld [vmem:[#allocation8 + $0x244] ss:$16 sps:$4 sm:$0xff]  }
 0x211   :  { %v488_v46 = vpop.f32.mrf.mxu1  ;;  %v3951_v44 = vld [vmem:[#allocation8 + $0x24] ss:$16 sps:$4 sm:$0xff]  }
 0x212   :  { %v593_v47 = vpack.c.bf16 %v516_v43, %v514_v42  ;;  %v489_v48 = vadd.f32 %v488_v46, %v4635_v31  ;;  %v517_v56 = vmax.f32 %v487_v45, 0.0  ;;  %v3946_v43 = vld [vmem:[#allocation8 + $0x240] ss:$16 sps:$4 sm:$0xff]   ;;  %v3954_v45 = vld [vmem:[#allocation8 + $0x224] ss:$16 sps:$4 sm:$0xff]  }
 0x213   :  { %v490_v52 = vpop.f32.mrf.mxu1 }
 0x214   :  { %v491_v55 = vadd.f32 %v490_v52, %v4638_v32  ;;  %973 = vmatprep.mubr.bf16.mxu1 %v593_v47  ;;  %1044 = vmatprep.mubr.bf16.mxu0 %v593_v47  ;;  %v518_v58 = vmax.f32 %v489_v48, 0.0  ;;  %v3949_v47 = vld [vmem:[#allocation8 + $0x20] ss:$16 sps:$4 sm:$0xff]  }
 0x215   :  { %v492_v57 = vpop.f32.mrf.mxu1  ;;  %974 = vmatmul.mubr.bf16.vlgmr.msra.gmra.mxu1 %v592_v51  ;;  %1045 = vmatmul.mubr.bf16.vlgmr.msra.gmra.mxu0 %v592_v51  ;;  %v3952_v48 = vld [vmem:[#allocation8 + $0x220] ss:$16 sps:$4 sm:$0xff]  }
 0x216   :  { %v519_v59 = vmax.f32 %v491_v55, 0.0  ;;  %v493_v60 = vadd.f32 %v492_v57, %v4635_v31  ;;  %1918 = vmatpush1.bf16.msra.mxu1 %v3913_v49  ;;  %1989 = vmatpush1.bf16.msra.mxu0 %v3916_v50  ;;  %v3957_v49 = vld [vmem:[#allocation8 + $0x4] ss:$16 sps:$4 sm:$0xff]   ;;  %v3955_v51 = vld [vmem:[#allocation8] ss:$16 sps:$4 sm:$0xff]  }
 0x217   :  { %v496_v63 = vpop.f32.mrf.mxu1  ;;  %1919 = vmatprep.subr.bf16.mxu1 %v3921_v53  ;;  %1990 = vmatprep.subr.bf16.mxu0 %v3924_v54  ;;  %v3960_v50 = vld [vmem:[#allocation8 + $0x204] ss:$16 sps:$4 sm:$0xff]   ;;  %v3958_v52 = vld [vmem:[#allocation8 + $0x200] ss:$16 sps:$4 sm:$0xff]  }
 0x218   :  { %v520_v3 = vmax.f32 %v493_v60, 0.0  ;;  %v594_v1 = vpack.c.bf16 %v519_v59, %v517_v56  ;;  %v497_v4 = vadd.f32 %v496_v63, %v4638_v32  ;;  %v3963_v53 = vld [vmem:[#allocation8 + $0x1e4] ss:$16 sps:$4 sm:$0xff]   ;;  %v3961_v55 = vld [vmem:[#allocation8 + $0x1e0] ss:$16 sps:$4 sm:$0xff]  }
 0x219   :  { %v498_v5 = vpop.f32.mrf.mxu1  ;;  %v3966_v54 = vld [vmem:[#allocation8 + $0x3e4] ss:$16 sps:$4 sm:$0xff]   ;;  %v3964_v56 = vld [vmem:[#allocation8 + $0x3e0] ss:$16 sps:$4 sm:$0xff]  }
 0x21a   :  { %v595_v6 = vpack.c.bf16 %v520_v3, %v518_v58  ;;  %v499_v7 = vadd.f32 %v498_v5, %v4635_v31  ;;  %1920 = vmatpush1.bf16.msra.mxu1 %v3919_v61  ;;  %1991 = vmatpush1.bf16.msra.mxu0 %v3922_v62  ;;  %v521_v14 = vmax.f32 %v497_v4, 0.0  ;;  %v3969_v57 = vld [vmem:[#allocation8 + $0x1c4] ss:$16 sps:$4 sm:$0xff]   ;;  %v3967_v59 = vld [vmem:[#allocation8 + $0x1c0] ss:$16 sps:$4 sm:$0xff]  }
 0x21b   :  { %v500_v10 = vpop.f32.mrf.mxu1  ;;  %1921 = vmatprep.subr.bf16.mxu1 %v3927_v0  ;;  %1992 = vmatprep.subr.bf16.mxu0 %v3930_v2  ;;  %v3972_v58 = vld [vmem:[#allocation8 + $0x3c4] ss:$16 sps:$4 sm:$0xff]   ;;  %v3970_v60 = vld [vmem:[#allocation8 + $0x3c0] ss:$16 sps:$4 sm:$0xff]  }
 0x21c   :  { %v501_v13 = vadd.f32 %v500_v10, %v4638_v32  ;;  %983 = vmatprep.mubr.bf16.mxu1 %v595_v6  ;;  %1054 = vmatprep.mubr.bf16.mxu0 %v595_v6  ;;  %v522_v16 = vmax.f32 %v499_v7, 0.0  ;;  %v3975_v61 = vld [vmem:[#allocation8 + $0x1a4] ss:$16 sps:$4 sm:$0xff]   ;;  %v3973_v63 = vld [vmem:[#allocation8 + $0x1a0] ss:$16 sps:$4 sm:$0xff]  }
 0x21d   :  { %v502_v15 = vpop.f32.mrf.mxu1  ;;  %984 = vmatmul.mubr.bf16.gmra.mxu1 %v594_v1  ;;  %1055 = vmatmul.mubr.bf16.gmra.mxu0 %v594_v1  ;;  %v3978_v62 = vld [vmem:[#allocation8 + $0x3a4] ss:$16 sps:$4 sm:$0xff]   ;;  %v3976_v0 = vld [vmem:[#allocation8 + $0x3a0] ss:$16 sps:$4 sm:$0xff]  }
 0x21e   :  { %v523_v17 = vmax.f32 %v501_v13, 0.0  ;;  %v503_v18 = vadd.f32 %v502_v15, %v4635_v31  ;;  %1922 = vmatpush1.bf16.msra.mxu1 %v3925_v8  ;;  %1993 = vmatpush1.bf16.msra.mxu0 %v3928_v9  ;;  %v3981_v2 = vld [vmem:[#allocation8 + $0x184] ss:$16 sps:$4 sm:$0xff]   ;;  %v3979_v1 = vld [vmem:[#allocation8 + $0x180] ss:$16 sps:$4 sm:$0xff]  }
 0x21f   :  { %v506_v21 = vpop.f32.mrf.mxu1  ;;  %1923 = vmatprep.subr.bf16.mxu1 %v3933_v11  ;;  %1994 = vmatprep.subr.bf16.mxu0 %v3936_v12  ;;  %v3984_v3 = vld [vmem:[#allocation8 + $0x384] ss:$16 sps:$4 sm:$0xff]   ;;  %v3982_v4 = vld [vmem:[#allocation8 + $0x380] ss:$16 sps:$4 sm:$0xff]  }
 0x220   :  { %v524_v24 = vmax.f32 %v503_v18, 0.0  ;;  %v596_v25 = vpack.c.bf16 %v523_v17, %v521_v14  ;;  %v507_v29 = vadd.f32 %v506_v21, %v4638_v32  ;;  %v3987_v5 = vld [vmem:[#allocation8 + $0x164] ss:$16 sps:$4 sm:$0xff]   ;;  %v3985_v7 = vld [vmem:[#allocation8 + $0x160] ss:$16 sps:$4 sm:$0xff]  }
 0x221   :  { %v508_v30 = vpop.f32.mrf.mxu1  ;;  %v3990_v6 = vld [vmem:[#allocation8 + $0x364] ss:$16 sps:$4 sm:$0xff]   ;;  %v3988_v8 = vld [vmem:[#allocation8 + $0x360] ss:$16 sps:$4 sm:$0xff]   ;;  %v4011_v21 = vld [vmem:[#allocation8 + $0xec] ss:$16 sps:$4 sm:$0xff]  }
 0x222   :  { %v597_v33 = vpack.c.bf16 %v524_v24, %v522_v16  ;;  %v509_v34 = vadd.f32 %v508_v30, %v4635_v31  ;;  %1924 = vmatpush1.bf16.msra.mxu1 %v3931_v19  ;;  %1995 = vmatpush1.bf16.msra.mxu0 %v3934_v20  ;;  %v525_v41 = vmax.f32 %v507_v29, 0.0  ;;  %v3943_v31 = vld [vmem:[#allocation8 + $0x40] ss:$16 sps:$4 sm:$0xff]   ;;  %v3993_v9 = vld [vmem:[#allocation8 + $0x144] ss:$16 sps:$4 sm:$0xff]   ;;  %v611_v24 = vsub.s32 2, %v4626_v26 }
 0x223   :  { %v510_v37 = vpop.f32.mrf.mxu1  ;;  %1925 = vmatprep.subr.bf16.mxu1 %v3939_v22  ;;  %1996 = vmatprep.subr.bf16.mxu0 %v3942_v23  ;;  %v3996_v10 = vld [vmem:[#allocation8 + $0x344] ss:$16 sps:$4 sm:$0xff]   ;;  %v3991_v11 = vld [vmem:[#allocation8 + $0x140] ss:$16 sps:$4 sm:$0xff]   ;;  %v4014_v22 = vld [vmem:[#allocation8 + $0x2ec] ss:$16 sps:$4 sm:$0xff]  }
 0x224   :  { %993 = vmatprep.mubr.bf16.mxu1 %v597_v33  ;;  %1064 = vmatprep.mubr.bf16.mxu0 %v597_v33  ;;  %v526_v40 = vmax.f32 %v509_v34, 0.0  ;;  %v598_v46 = vpack.c.bf16 %v525_v41, %v525_v41  ;;  %v3994_v12 = vld [vmem:[#allocation8 + $0x340] ss:$16 sps:$4 sm:$0xff]   ;;  %v3999_v13 = vld [vmem:[#allocation8 + $0x124] ss:$16 sps:$4 sm:$0xff]   ;;  %v615_v23 = vsub.s32 3, %v4626_v26 }
 0x225   :  { %994 = vmatmul.mubr.bf16.gmra.mxu1 %v596_v25  ;;  %1065 = vmatmul.mubr.bf16.gmra.mxu0 %v596_v25  ;;  %v511_v32 = vpop.f32.mrf.mxu1  ;;  %v4002_v14 = vld [vmem:[#allocation8 + $0x324] ss:$16 sps:$4 sm:$0xff]   ;;  %v3997_v15 = vld [vmem:[#allocation8 + $0x120] ss:$16 sps:$4 sm:$0xff]   ;;  %v591_v25 = vld [vmem:[%s4953_s6] sm:$0xf] }
 0x226   :  { %v599_v42 = vpack.c.bf16 %v526_v40, %v526_v40  ;;  %1926 = vmatpush1.bf16.msra.mxu1 %v3937_v35  ;;  %1997 = vmatpush1.bf16.msra.mxu0 %v3940_v36  ;;  %v4000_v16 = vld [vmem:[#allocation8 + $0x320] ss:$16 sps:$4 sm:$0xff]   ;;  %v4005_v17 = vld [vmem:[#allocation8 + $0x104] ss:$16 sps:$4 sm:$0xff]   ;;  %v4660_v33 = vrot.slane %v591_v25, %v4629_v27  ;;  %v4664_v34 = vrot.slane %v591_v25, %v615_v23 }
 0x227   :  { %1927 = vmatprep.subr.bf16.mxu1 %v3945_v38  ;;  %1998 = vmatprep.subr.bf16.mxu0 %v3948_v39  ;;  %v4008_v18 = vld [vmem:[#allocation8 + $0x304] ss:$16 sps:$4 sm:$0xff]   ;;  %v4003_v19 = vld [vmem:[#allocation8 + $0x100] ss:$16 sps:$4 sm:$0xff]   ;;  %v4667_v35 = vrot.slane %v591_v25, %v4632_v28  ;;  %v4671_v36 = vrot.slane %v591_v25, %v611_v24  ;;  %v4015_v25 = vld [vmem:[#allocation8 + $0xc8] ss:$16 sps:$4 sm:$0xff]  }
 0x228   :  { %1003 = vmatprep.mubr.bf16.mxu1 %v599_v42  ;;  %1074 = vmatprep.mubr.bf16.mxu0 %v599_v42  ;;  %v4006_v20 = vld [vmem:[#allocation8 + $0x300] ss:$16 sps:$4 sm:$0xff]  }
 0x22a   :  { %1928 = vmatpush1.bf16.msra.mxu1 %v3943_v31  ;;  %1999 = vmatpush1.bf16.msra.mxu0 %v3946_v43 }
 0x22b   :  { %1929 = vmatprep.subr.bf16.mxu1 %v3951_v44  ;;  %2000 = vmatprep.subr.bf16.mxu0 %v3954_v45 }
 0x22d   :  { %1004 = vmatmul.mubr.bf16.gmra.mxu1 %v598_v46  ;;  %1075 = vmatmul.mubr.bf16.gmra.mxu0 %v598_v46 }
 0x22e   :  { %1930 = vmatpush1.bf16.msra.mxu1 %v3949_v47  ;;  %2001 = vmatpush1.bf16.msra.mxu0 %v3952_v48 }
 0x22f   :  { %1931 = vmatprep.subr.bf16.mxu1 %v3957_v49  ;;  %2002 = vmatprep.subr.bf16.mxu0 %v3960_v50 }
 0x232   :  { %1932 = vmatpush1.bf16.msra.mxu1 %v3955_v51  ;;  %2003 = vmatpush1.bf16.msra.mxu0 %v3958_v52 }
 0x233   :  { %1933 = vmatprep.subr.bf16.mxu1 %v3963_v53  ;;  %2004 = vmatprep.subr.bf16.mxu0 %v3966_v54 }
 0x236   :  { %1934 = vmatpush2.bf16.msra.mxu1 %v3961_v55  ;;  %2005 = vmatpush2.bf16.msra.mxu0 %v3964_v56 }
 0x237   :  { %1935 = vmatprep.subr.bf16.mxu1 %v3969_v57  ;;  %2006 = vmatprep.subr.bf16.mxu0 %v3972_v58 }
 0x23a   :  { %1936 = vmatpush2.bf16.msra.mxu1 %v3967_v59  ;;  %2007 = vmatpush2.bf16.msra.mxu0 %v3970_v60 }
 0x23b   :  { %1937 = vmatprep.subr.bf16.mxu1 %v3975_v61  ;;  %2008 = vmatprep.subr.bf16.mxu0 %v3978_v62 }
 0x23e   :  { %1938 = vmatpush2.bf16.msra.mxu1 %v3973_v63  ;;  %2009 = vmatpush2.bf16.msra.mxu0 %v3976_v0 }
 0x23f   :  { %1939 = vmatprep.subr.bf16.mxu1 %v3981_v2  ;;  %2010 = vmatprep.subr.bf16.mxu0 %v3984_v3 }
 0x242   :  { %1940 = vmatpush2.bf16.msra.mxu1 %v3979_v1  ;;  %2011 = vmatpush2.bf16.msra.mxu0 %v3982_v4  ;;  %v4009_v1 = vld [vmem:[#allocation8 + $0xe8] ss:$16 sps:$4 sm:$0xff]  }
 0x243   :  { %1941 = vmatprep.subr.bf16.mxu1 %v3987_v5  ;;  %2012 = vmatprep.subr.bf16.mxu0 %v3990_v6  ;;  %v4012_v4 = vld [vmem:[#allocation8 + $0x2e8] ss:$16 sps:$4 sm:$0xff]  }
 0x246   :  { %1942 = vmatpush2.bf16.msra.mxu1 %v3985_v7  ;;  %2013 = vmatpush2.bf16.msra.mxu0 %v3988_v8 }
 0x247   :  { %1943 = vmatprep.subr.bf16.mxu1 %v3993_v9  ;;  %2014 = vmatprep.subr.bf16.mxu0 %v3996_v10  ;;  %v4017_v9 = vld [vmem:[#allocation8 + $0xcc] ss:$16 sps:$4 sm:$0xff]  }
 0x248   :  { %v4020_v10 = vld [vmem:[#allocation8 + $0x2cc] ss:$16 sps:$4 sm:$0xff]  }
 0x24a   :  { %1944 = vmatpush2.bf16.msra.mxu1 %v3991_v11  ;;  %2015 = vmatpush2.bf16.msra.mxu0 %v3994_v12 }
 0x24b   :  { %1945 = vmatprep.subr.bf16.mxu1 %v3999_v13  ;;  %2016 = vmatprep.subr.bf16.mxu0 %v4002_v14 }
 0x24e   :  { %1946 = vmatpush2.bf16.msra.mxu1 %v3997_v15  ;;  %2017 = vmatpush2.bf16.msra.mxu0 %v4000_v16 }
 0x24f   :  { %1947 = vmatprep.subr.bf16.mxu1 %v4005_v17  ;;  %2018 = vmatprep.subr.bf16.mxu0 %v4008_v18 }
 0x252   :  { %1948 = vmatpush2.bf16.msra.mxu1 %v4003_v19  ;;  %2019 = vmatpush2.bf16.msra.mxu0 %v4006_v20 }
 0x253   :  { %2059 = vmatprep.subr.bf16.mxu1 %v4011_v21  ;;  %2130 = vmatprep.subr.bf16.mxu0 %v4014_v22 }
 0x2d5   :  { %v975_v29 = vpop.f32.mrf.mxu1  ;;  %v1046_v30 = vpop.f32.mrf.mxu0 }
 0x2d6   :  { %v976_v43 = vadd.f32 %v975_v29, %v4667_v35  ;;  %v1047_v44 = vadd.f32 %v1046_v30, %v4671_v36 }
 0x2d7   :  { %v977_v37 = vpop.f32.mrf.mxu1  ;;  %v1048_v38 = vpop.f32.mrf.mxu0 }
 0x2d8   :  { %v978_v41 = vadd.f32 %v977_v37, %v4660_v33  ;;  %v1049_v32 = vadd.f32 %v1048_v38, %v4664_v34  ;;  %v1083_v57 = vmax.f32 %v976_v43, 0.0  ;;  %v1085_v58 = vmax.f32 %v1047_v44, 0.0  ;;  %v4018_v37 = vld [vmem:[#allocation8 + $0x2c8] ss:$16 sps:$4 sm:$0xff]   ;;  %v4023_v38 = vld [vmem:[#allocation8 + $0xac] ss:$16 sps:$4 sm:$0xff]  }
 0x2d9   :  { %v979_v39 = vpop.f32.mrf.mxu1  ;;  %v1050_v40 = vpop.f32.mrf.mxu0 }
 0x2da   :  { %v980_v42 = vadd.f32 %v979_v39, %v4667_v35  ;;  %v1051_v31 = vadd.f32 %v1050_v40, %v4671_v36  ;;  %v1084_v53 = vmax.f32 %v978_v41, 0.0  ;;  %v1086_v54 = vmax.f32 %v1049_v32, 0.0 }
 0x2db   :  { %v981_v45 = vpop.f32.mrf.mxu1  ;;  %v1052_v46 = vpop.f32.mrf.mxu0 }
 0x2dc   :  { %v982_v47 = vadd.f32 %v981_v45, %v4660_v33  ;;  %v1053_v48 = vadd.f32 %v1052_v46, %v4664_v34  ;;  %v1087_v49 = vmax.f32 %v980_v42, 0.0  ;;  %v1089_v50 = vmax.f32 %v1051_v31, 0.0  ;;  %v4026_v45 = vld [vmem:[#allocation8 + $0x2ac] ss:$16 sps:$4 sm:$0xff]  }
 0x2dd   :  { %v985_v51 = vpop.f32.mrf.mxu1  ;;  %v1056_v52 = vpop.f32.mrf.mxu0 }
 0x2de   :  { %v1088_v55 = vmax.f32 %v982_v47, 0.0  ;;  %v1090_v56 = vmax.f32 %v1053_v48, 0.0  ;;  %v986_v59 = vadd.f32 %v985_v51, %v4667_v35  ;;  %v1057_v60 = vadd.f32 %v1056_v52, %v4671_v36 }
 0x2df   :  { %v987_v61 = vpop.f32.mrf.mxu1  ;;  %v1058_v62 = vpop.f32.mrf.mxu0  ;;  %v4689_v5 = vpack.c.bf16 %v1087_v49, %v1083_v57  ;;  %v4691_v6 = vpack.c.bf16 %v1089_v50, %v1085_v58  ;;  %v4021_v50 = vld [vmem:[#allocation8 + $0xa8] ss:$16 sps:$4 sm:$0xff]   ;;  %v4032_v57 = vld [vmem:[#allocation8 + $0x28c] ss:$16 sps:$4 sm:$0xff]  }
 0x2e0   :  { %v4683_v63 = vpack.c.bf16 %v1088_v55, %v1084_v53  ;;  %v4685_v0 = vpack.c.bf16 %v1090_v56, %v1086_v54  ;;  %v988_v2 = vadd.f32 %v987_v61, %v4660_v33  ;;  %v1059_v3 = vadd.f32 %v1058_v62, %v4664_v34  ;;  %v4024_v53 = vld [vmem:[#allocation8 + $0x2a8] ss:$16 sps:$4 sm:$0xff]   ;;  %v4029_v54 = vld [vmem:[#allocation8 + $0x8c] ss:$16 sps:$4 sm:$0xff]  }
 0x2e1   :  { %v989_v7 = vpop.f32.mrf.mxu1  ;;  %v1060_v8 = vpop.f32.mrf.mxu0  ;;  %v1091_v13 = vmax.f32 %v986_v59, 0.0  ;;  %v1093_v14 = vmax.f32 %v1057_v60, 0.0 }
 0x2e2   :  { %v990_v11 = vadd.f32 %v989_v7, %v4667_v35  ;;  %v1061_v12 = vadd.f32 %v1060_v8, %v4671_v36  ;;  %1949 = vmatprep.mubr.bf16.mxu1 %v4683_v63  ;;  %2020 = vmatprep.mubr.bf16.mxu0 %v4685_v0  ;;  %v1092_v15 = vmax.f32 %v988_v2, 0.0  ;;  %v1094_v16 = vmax.f32 %v1059_v3, 0.0  ;;  %v4027_v8 = vld [vmem:[#allocation8 + $0x88] ss:$16 sps:$4 sm:$0xff]  }
 0x2e3   :  { %v991_v17 = vpop.f32.mrf.mxu1  ;;  %v1062_v18 = vpop.f32.mrf.mxu0  ;;  %1950 = vmatmul.mubr.bf16.vlgmr.msra.gmra.mxu1 %v4689_v5  ;;  %2021 = vmatmul.mubr.bf16.vlgmr.msra.gmra.mxu0 %v4691_v6 }
 0x2e4   :  { %v1095_v19 = vmax.f32 %v990_v11, 0.0  ;;  %v1097_v20 = vmax.f32 %v1061_v12, 0.0  ;;  %v992_v21 = vadd.f32 %v991_v17, %v4660_v33  ;;  %v1063_v22 = vadd.f32 %v1062_v18, %v4664_v34  ;;  %2060 = vmatpush1.bf16.msra.mxu1 %v4009_v1  ;;  %2131 = vmatpush1.bf16.msra.mxu0 %v4012_v4  ;;  %v4035_v12 = vld [vmem:[#allocation8 + $0x6c] ss:$16 sps:$4 sm:$0xff]  }
 0x2e5   :  { %v995_v29 = vpop.f32.mrf.mxu1  ;;  %v1066_v30 = vpop.f32.mrf.mxu0  ;;  %2061 = vmatprep.subr.bf16.mxu1 %v4017_v9  ;;  %2132 = vmatprep.subr.bf16.mxu0 %v4020_v10  ;;  %v4030_v9 = vld [vmem:[#allocation8 + $0x288] ss:$16 sps:$4 sm:$0xff]  }
 0x2e6   :  { %v1096_v39 = vmax.f32 %v992_v21, 0.0  ;;  %v1098_v40 = vmax.f32 %v1063_v22, 0.0  ;;  %v4701_v41 = vpack.c.bf16 %v1095_v19, %v1091_v13  ;;  %v4703_v32 = vpack.c.bf16 %v1097_v20, %v1093_v14  ;;  %v4038_v19 = vld [vmem:[#allocation8 + $0x26c] ss:$16 sps:$4 sm:$0xff]  }
 0x2e7   :  { %v996_v42 = vadd.f32 %v995_v29, %v4667_v35  ;;  %v1067_v31 = vadd.f32 %v1066_v30, %v4671_v36  ;;  %v997_v43 = vpop.f32.mrf.mxu1  ;;  %v1068_v44 = vpop.f32.mrf.mxu0  ;;  %v4033_v29 = vld [vmem:[#allocation8 + $0x68] ss:$16 sps:$4 sm:$0xff]  }
 0x2e8   :  { %v4707_v46 = vpack.c.bf16 %v1096_v39, %v1092_v15  ;;  %v4709_v47 = vpack.c.bf16 %v1098_v40, %v1094_v16  ;;  %v998_v48 = vadd.f32 %v997_v43, %v4660_v33  ;;  %v1069_v49 = vadd.f32 %v1068_v44, %v4664_v34  ;;  %2062 = vmatpush1.bf16.msra.mxu1 %v4015_v25  ;;  %v4041_v39 = vld [vmem:[#allocation8 + $0x4c] ss:$16 sps:$4 sm:$0xff]  }
 0x2e9   :  { %2133 = vmatpush1.bf16.msra.mxu0 %v4018_v37  ;;  %v999_v51 = vpop.f32.mrf.mxu1  ;;  %v1070_v52 = vpop.f32.mrf.mxu0  ;;  %2063 = vmatprep.subr.bf16.mxu1 %v4023_v38  ;;  %v1099_v58 = vmax.f32 %v996_v42, 0.0  ;;  %v1101_v59 = vmax.f32 %v1067_v31, 0.0  ;;  %v4036_v38 = vld [vmem:[#allocation8 + $0x268] ss:$16 sps:$4 sm:$0xff]   ;;  %v4044_v31 = vld [vmem:[#allocation8 + $0x24c] ss:$16 sps:$4 sm:$0xff]  }
 0x2ea   :  { %v1000_v55 = vadd.f32 %v999_v51, %v4667_v35  ;;  %v1071_v56 = vadd.f32 %v1070_v52, %v4671_v36  ;;  %1959 = vmatprep.mubr.bf16.mxu1 %v4707_v46  ;;  %2030 = vmatprep.mubr.bf16.mxu0 %v4709_v47  ;;  %v1100_v60 = vmax.f32 %v998_v48, 0.0  ;;  %v1102_v61 = vmax.f32 %v1069_v49, 0.0  ;;  %v4039_v49 = vld [vmem:[#allocation8 + $0x48] ss:$16 sps:$4 sm:$0xff]   ;;  %v4047_v51 = vld [vmem:[#allocation8 + $0x2c] ss:$16 sps:$4 sm:$0xff]  }
 0x2eb   :  { %2134 = vmatprep.subr.bf16.mxu0 %v4026_v45  ;;  %v1001_v62 = vpop.f32.mrf.mxu1  ;;  %v1072_v2 = vpop.f32.mrf.mxu0  ;;  %1960 = vmatmul.mubr.bf16.gmra.mxu1 %v4701_v41  ;;  %v4050_v52 = vld [vmem:[#allocation8 + $0x22c] ss:$16 sps:$4 sm:$0xff]  }
 0x2ec   :  { %v1103_v3 = vmax.f32 %v1000_v55, 0.0  ;;  %v1105_v1 = vmax.f32 %v1071_v56, 0.0  ;;  %v1002_v4 = vadd.f32 %v1001_v62, %v4660_v33  ;;  %v1073_v7 = vadd.f32 %v1072_v2, %v4664_v34  ;;  %2031 = vmatmul.mubr.bf16.gmra.mxu0 %v4703_v32  ;;  %2064 = vmatpush1.bf16.msra.mxu1 %v4021_v50  ;;  %v4042_v50 = vld [vmem:[#allocation8 + $0x248] ss:$16 sps:$4 sm:$0xff]   ;;  %v4062_v62 = vld [vmem:[#allocation8 + $0x3ec] ss:$16 sps:$4 sm:$0xff]  }
 0x2ed   :  { %2135 = vmatpush1.bf16.msra.mxu0 %v4024_v53  ;;  %2065 = vmatprep.subr.bf16.mxu1 %v4029_v54  ;;  %v1005_v10 = vpop.f32.mrf.mxu1  ;;  %v1076_v11 = vpop.f32.mrf.mxu0  ;;  %v4045_v55 = vld [vmem:[#allocation8 + $0x28] ss:$16 sps:$4 sm:$0xff]  }
 0x2ee   :  { %v1104_v13 = vmax.f32 %v1002_v4, 0.0  ;;  %v1106_v14 = vmax.f32 %v1073_v7, 0.0  ;;  %2136 = vmatprep.subr.bf16.mxu0 %v4032_v57  ;;  %v4721_v15 = vpack.c.bf16 %v1103_v3, %v1099_v58  ;;  %v4723_v16 = vpack.c.bf16 %v1105_v1, %v1101_v59  ;;  %v4048_v56 = vld [vmem:[#allocation8 + $0x228] ss:$16 sps:$4 sm:$0xff]   ;;  %v4053_v57 = vld [vmem:[#allocation8 + $0xc] ss:$16 sps:$4 sm:$0xff]  }
 0x2ef   :  { %v1006_v17 = vadd.f32 %v1005_v10, %v4667_v35  ;;  %v1077_v18 = vadd.f32 %v1076_v11, %v4671_v36  ;;  %v1007_v20 = vpop.f32.mrf.mxu1  ;;  %v1078_v21 = vpop.f32.mrf.mxu0  ;;  %v4056_v58 = vld [vmem:[#allocation8 + $0x20c] ss:$16 sps:$4 sm:$0xff]   ;;  %v4051_v59 = vld [vmem:[#allocation8 + $0x8] ss:$16 sps:$4 sm:$0xff]  }
 0x2f0   :  { %v4727_v22 = vpack.c.bf16 %v1104_v13, %v1100_v60  ;;  %v4729_v25 = vpack.c.bf16 %v1106_v14, %v1102_v61  ;;  %2066 = vmatpush1.bf16.msra.mxu1 %v4027_v8  ;;  %v1008_v30 = vadd.f32 %v1007_v20, %v4660_v33  ;;  %v1079_v37 = vadd.f32 %v1078_v21, %v4664_v34  ;;  %v4054_v60 = vld [vmem:[#allocation8 + $0x208] ss:$16 sps:$4 sm:$0xff]   ;;  %v4059_v61 = vld [vmem:[#allocation8 + $0x1ec] ss:$16 sps:$4 sm:$0xff]  }
 0x2f1   :  { %2137 = vmatpush1.bf16.msra.mxu0 %v4030_v9  ;;  %2067 = vmatprep.subr.bf16.mxu1 %v4035_v12  ;;  %v1009_v35 = vpop.f32.mrf.mxu1  ;;  %v1080_v40 = vpop.f32.mrf.mxu0  ;;  %v1107_v43 = vmax.f32 %v1006_v17, 0.0  ;;  %v1109_v34 = vmax.f32 %v1077_v18, 0.0  ;;  %v4057_v2 = vld [vmem:[#allocation8 + $0x1e8] ss:$16 sps:$4 sm:$0xff]   ;;  %v4065_v1 = vld [vmem:[#allocation8 + $0x1cc] ss:$16 sps:$4 sm:$0xff]  }
 0x2f2   :  { %1969 = vmatprep.mubr.bf16.mxu1 %v4727_v22  ;;  %2040 = vmatprep.mubr.bf16.mxu0 %v4729_v25  ;;  %v1108_v36 = vmax.f32 %v1008_v30, 0.0  ;;  %v1110_v42 = vmax.f32 %v1079_v37, 0.0  ;;  %v4060_v3 = vld [vmem:[#allocation8 + $0x3e8] ss:$16 sps:$4 sm:$0xff]   ;;  %v4068_v4 = vld [vmem:[#allocation8 + $0x3cc] ss:$16 sps:$4 sm:$0xff]  }
 0x2f3   :  { %2138 = vmatprep.subr.bf16.mxu0 %v4038_v19  ;;  %1970 = vmatmul.mubr.bf16.gmra.mxu1 %v4721_v15  ;;  %v1010_v33 = vpop.f32.mrf.mxu1  ;;  %v1081_v44 = vpop.f32.mrf.mxu0  ;;  %v4742_v53 = vpack.c.bf16 %v1107_v43, %v1107_v43  ;;  %v4745_v54 = vpack.c.bf16 %v1109_v34, %v1109_v34  ;;  %v4063_v7 = vld [vmem:[#allocation8 + $0x1c8] ss:$16 sps:$4 sm:$0xff]   ;;  %v4071_v8 = vld [vmem:[#allocation8 + $0x1ac] ss:$16 sps:$4 sm:$0xff]  }
 0x2f4   :  { %v4736_v45 = vpack.c.bf16 %v1108_v36, %v1108_v36  ;;  %v4738_v48 = vpack.c.bf16 %v1110_v42, %v1110_v42  ;;  %2041 = vmatmul.mubr.bf16.gmra.mxu0 %v4723_v16  ;;  %2068 = vmatpush1.bf16.msra.mxu1 %v4033_v29  ;;  %v4074_v9 = vld [vmem:[#allocation8 + $0x3ac] ss:$16 sps:$4 sm:$0xff]   ;;  %v4072_v10 = vld [vmem:[#allocation8 + $0x3a8] ss:$16 sps:$4 sm:$0xff]  }
 0x2f5   :  { %2139 = vmatpush1.bf16.msra.mxu0 %v4036_v38  ;;  %2069 = vmatprep.subr.bf16.mxu1 %v4041_v39  ;;  %v4077_v11 = vld [vmem:[#allocation8 + $0x18c] ss:$16 sps:$4 sm:$0xff]   ;;  %v4075_v13 = vld [vmem:[#allocation8 + $0x188] ss:$16 sps:$4 sm:$0xff]  }
 0x2f6   :  { %2140 = vmatprep.subr.bf16.mxu0 %v4044_v31  ;;  %1979 = vmatprep.mubr.bf16.mxu1 %v4736_v45  ;;  %v4080_v12 = vld [vmem:[#allocation8 + $0x38c] ss:$16 sps:$4 sm:$0xff]   ;;  %v4078_v14 = vld [vmem:[#allocation8 + $0x388] ss:$16 sps:$4 sm:$0xff]  }
 0x2f7   :  { %2050 = vmatprep.mubr.bf16.mxu0 %v4738_v48  ;;  %v4083_v17 = vld [vmem:[#allocation8 + $0x16c] ss:$16 sps:$4 sm:$0xff]   ;;  %v4081_v19 = vld [vmem:[#allocation8 + $0x168] ss:$16 sps:$4 sm:$0xff]  }
 0x2f8   :  { %2070 = vmatpush1.bf16.msra.mxu1 %v4039_v49  ;;  %v4086_v18 = vld [vmem:[#allocation8 + $0x36c] ss:$16 sps:$4 sm:$0xff]   ;;  %v4084_v20 = vld [vmem:[#allocation8 + $0x368] ss:$16 sps:$4 sm:$0xff]  }
 0x2f9   :  { %2141 = vmatpush1.bf16.msra.mxu0 %v4042_v50  ;;  %2071 = vmatprep.subr.bf16.mxu1 %v4047_v51  ;;  %v4089_v21 = vld [vmem:[#allocation8 + $0x14c] ss:$16 sps:$4 sm:$0xff]   ;;  %v4087_v30 = vld [vmem:[#allocation8 + $0x148] ss:$16 sps:$4 sm:$0xff]  }
 0x2fa   :  { %2142 = vmatprep.subr.bf16.mxu0 %v4050_v52  ;;  %v4092_v29 = vld [vmem:[#allocation8 + $0x34c] ss:$16 sps:$4 sm:$0xff]   ;;  %v4090_v37 = vld [vmem:[#allocation8 + $0x348] ss:$16 sps:$4 sm:$0xff]  }
 0x2fb   :  { %1980 = vmatmul.mubr.bf16.gmra.mxu1 %v4742_v53  ;;  %v4095_v38 = vld [vmem:[#allocation8 + $0x12c] ss:$16 sps:$4 sm:$0xff]   ;;  %v4093_v35 = vld [vmem:[#allocation8 + $0x128] ss:$16 sps:$4 sm:$0xff]  }
 0x2fc   :  { %2051 = vmatmul.mubr.bf16.gmra.mxu0 %v4745_v54  ;;  %2072 = vmatpush1.bf16.msra.mxu1 %v4045_v55  ;;  %v4098_v39 = vld [vmem:[#allocation8 + $0x32c] ss:$16 sps:$4 sm:$0xff]   ;;  %v4096_v40 = vld [vmem:[#allocation8 + $0x328] ss:$16 sps:$4 sm:$0xff]  }
 0x2fd   :  { %2143 = vmatpush1.bf16.msra.mxu0 %v4048_v56  ;;  %2091 = vmatprep.mubr.bf16.mxu1 %v4683_v63  ;;  %v4066_v63 = vld [vmem:[#allocation8 + $0x3c8] ss:$16 sps:$4 sm:$0xff]   ;;  %v4101_v36 = vld [vmem:[#allocation8 + $0x10c] ss:$16 sps:$4 sm:$0xff]  }
 0x2fe   :  { %2162 = vmatprep.mubr.bf16.mxu0 %v4685_v0  ;;  %2073 = vmatprep.subr.bf16.mxu1 %v4053_v57  ;;  %v4069_v0 = vld [vmem:[#allocation8 + $0x1a8] ss:$16 sps:$4 sm:$0xff]   ;;  %v4104_v42 = vld [vmem:[#allocation8 + $0x30c] ss:$16 sps:$4 sm:$0xff]  }
 0x2ff   :  { %2144 = vmatprep.subr.bf16.mxu0 %v4056_v58  ;;  %v4099_v31 = vld [vmem:[#allocation8 + $0x108] ss:$16 sps:$4 sm:$0xff]   ;;  %v4107_v33 = vld [vmem:[#allocation10 + $0x74] ss:$8 sps:$4 sm:$0xff]   ;;  %v4110_v34 = vld [vmem:[#allocation10 + $0x64] ss:$8 sps:$4 sm:$0xff]  }
 0x300   :  { %2074 = vmatpush1.bf16.msra.mxu1 %v4051_v59  ;;  %v4102_v43 = vld [vmem:[#allocation8 + $0x308] ss:$16 sps:$4 sm:$0xff]   ;;  %v4113_v50 = vld [vmem:[#allocation10 + $0x54] ss:$8 sps:$4 sm:$0xff]   ;;  %v4116_v52 = vld [vmem:[#allocation10 + $0x44] ss:$8 sps:$4 sm:$0xff]  }
 0x301   :  { %2145 = vmatpush1.bf16.msra.mxu0 %v4054_v60  ;;  %2075 = vmatprep.subr.bf16.mxu1 %v4059_v61  ;;  %v4105_v44 = vld [vmem:[#allocation10 + $0x70] ss:$8 sps:$4 sm:$0xff]   ;;  %v4108_v49 = vld [vmem:[#allocation10 + $0x60] ss:$8 sps:$4 sm:$0xff]   ;;  %v4155_v55 = vld [vmem:[#allocation10 + $0x174] ss:$8 sps:$4 sm:$0xff]  }
 0x302   :  { %2146 = vmatprep.subr.bf16.mxu0 %v4062_v62  ;;  %v4111_v51 = vld [vmem:[#allocation10 + $0x50] ss:$8 sps:$4 sm:$0xff]   ;;  %v4161_v58 = vld [vmem:[#allocation10 + $0x154] ss:$8 sps:$4 sm:$0xff]   ;;  %v4164_v59 = vld [vmem:[#allocation10 + $0x144] ss:$8 sps:$4 sm:$0xff]  }
 0x303   :  { %v4153_v56 = vld [vmem:[#allocation10 + $0x170] ss:$8 sps:$4 sm:$0xff]   ;;  %v4162_v60 = vld [vmem:[#allocation10 + $0x140] ss:$8 sps:$4 sm:$0xff]   ;;  %v4134_v62 = vld [vmem:[#allocation10 + $0xe4] ss:$8 sps:$4 sm:$0xff]  }
 0x304   :  { %2076 = vmatpush2.bf16.msra.mxu1 %v4057_v2  ;;  %v4123_v57 = vld [vmem:[#allocation10 + $0x10] ss:$8 sps:$4 sm:$0xff]   ;;  %v4167_v2 = vld [vmem:[#allocation10 + $0x134] ss:$8 sps:$4 sm:$0xff]  }
 0x305   :  { %2147 = vmatpush2.bf16.msra.mxu0 %v4060_v3  ;;  %2077 = vmatprep.subr.bf16.mxu1 %v4065_v1  ;;  %v4129_v61 = vld [vmem:[#allocation10 + $0xf0] ss:$8 sps:$4 sm:$0xff]   ;;  %v4170_v3 = vld [vmem:[#allocation10 + $0x124] ss:$8 sps:$4 sm:$0xff]   ;;  %v4137_v1 = vld [vmem:[#allocation10 + $0xd4] ss:$8 sps:$4 sm:$0xff]  }
 0x306   :  { %2148 = vmatprep.subr.bf16.mxu0 %v4068_v4  ;;  %v4168_v4 = vld [vmem:[#allocation10 + $0x120] ss:$8 sps:$4 sm:$0xff]  }
 0x308   :  { %2078 = vmatpush2.bf16.msra.mxu1 %v4063_v7  ;;  %v4173_v7 = vld [vmem:[#allocation10 + $0x114] ss:$8 sps:$4 sm:$0xff]  }
 0x309   :  { %2149 = vmatpush2.bf16.msra.mxu0 %v4066_v63  ;;  %2079 = vmatprep.subr.bf16.mxu1 %v4071_v8  ;;  %v4135_v63 = vld [vmem:[#allocation10 + $0xd0] ss:$8 sps:$4 sm:$0xff]   ;;  %v4140_v8 = vld [vmem:[#allocation10 + $0xc4] ss:$8 sps:$4 sm:$0xff]  }
 0x30a   :  { %2150 = vmatprep.subr.bf16.mxu0 %v4074_v9  ;;  %v4171_v9 = vld [vmem:[#allocation10 + $0x110] ss:$8 sps:$4 sm:$0xff]  }
 0x30c   :  { %2080 = vmatpush2.bf16.msra.mxu1 %v4069_v0  ;;  %v4176_v0 = vld [vmem:[#allocation10 + $0x104] ss:$8 sps:$4 sm:$0xff]  }
 0x30d   :  { %2151 = vmatpush2.bf16.msra.mxu0 %v4072_v10  ;;  %2081 = vmatprep.subr.bf16.mxu1 %v4077_v11  ;;  %v4138_v10 = vld [vmem:[#allocation10 + $0xc0] ss:$8 sps:$4 sm:$0xff]   ;;  %v4143_v11 = vld [vmem:[#allocation10 + $0xb4] ss:$8 sps:$4 sm:$0xff]  }
 0x30e   :  { %2152 = vmatprep.subr.bf16.mxu0 %v4080_v12  ;;  %v4174_v12 = vld [vmem:[#allocation10 + $0x100] ss:$8 sps:$4 sm:$0xff]  }
 0x310   :  { %2082 = vmatpush2.bf16.msra.mxu1 %v4075_v13  ;;  %v4179_v13 = vld [vmem:[#allocation10 + $0x1f4] ss:$8 sps:$4 sm:$0xff]  }
 0x311   :  { %2153 = vmatpush2.bf16.msra.mxu0 %v4078_v14  ;;  %2083 = vmatprep.subr.bf16.mxu1 %v4083_v17  ;;  %v4141_v14 = vld [vmem:[#allocation10 + $0xb0] ss:$8 sps:$4 sm:$0xff]   ;;  %v4146_v17 = vld [vmem:[#allocation10 + $0xa4] ss:$8 sps:$4 sm:$0xff]  }
 0x312   :  { %2154 = vmatprep.subr.bf16.mxu0 %v4086_v18  ;;  %v4177_v18 = vld [vmem:[#allocation10 + $0x1f0] ss:$8 sps:$4 sm:$0xff]  }
 0x314   :  { %2084 = vmatpush2.bf16.msra.mxu1 %v4081_v19  ;;  %v4182_v19 = vld [vmem:[#allocation10 + $0x1e4] ss:$8 sps:$4 sm:$0xff]  }
 0x315   :  { %2155 = vmatpush2.bf16.msra.mxu0 %v4084_v20  ;;  %2085 = vmatprep.subr.bf16.mxu1 %v4089_v21  ;;  %v4144_v20 = vld [vmem:[#allocation10 + $0xa0] ss:$8 sps:$4 sm:$0xff]   ;;  %v4149_v21 = vld [vmem:[#allocation10 + $0x94] ss:$8 sps:$4 sm:$0xff]  }
 0x316   :  { %2156 = vmatprep.subr.bf16.mxu0 %v4092_v29  ;;  %v4180_v29 = vld [vmem:[#allocation10 + $0x1e0] ss:$8 sps:$4 sm:$0xff]  }
 0x318   :  { %2086 = vmatpush2.bf16.msra.mxu1 %v4087_v30  ;;  %v4185_v30 = vld [vmem:[#allocation10 + $0x1d4] ss:$8 sps:$4 sm:$0xff]  }
 0x319   :  { %2157 = vmatpush2.bf16.msra.mxu0 %v4090_v37  ;;  %2087 = vmatprep.subr.bf16.mxu1 %v4095_v38  ;;  %v4147_v37 = vld [vmem:[#allocation10 + $0x90] ss:$8 sps:$4 sm:$0xff]   ;;  %v4152_v38 = vld [vmem:[#allocation10 + $0x84] ss:$8 sps:$4 sm:$0xff]  }
 0x31a   :  { %2158 = vmatprep.subr.bf16.mxu0 %v4098_v39  ;;  %v4183_v39 = vld [vmem:[#allocation10 + $0x1d0] ss:$8 sps:$4 sm:$0xff]  }
 0x31c   :  { %2088 = vmatpush2.bf16.msra.mxu1 %v4093_v35  ;;  %v4188_v35 = vld [vmem:[#allocation10 + $0x1c4] ss:$8 sps:$4 sm:$0xff]  }
 0x31d   :  { %2159 = vmatpush2.bf16.msra.mxu0 %v4096_v40  ;;  %2089 = vmatprep.subr.bf16.mxu1 %v4101_v36  ;;  %v4150_v40 = vld [vmem:[#allocation10 + $0x80] ss:$8 sps:$4 sm:$0xff]  }
 0x31e   :  { %2160 = vmatprep.subr.bf16.mxu0 %v4104_v42  ;;  %v4186_v36 = vld [vmem:[#allocation10 + $0x1c0] ss:$8 sps:$4 sm:$0xff]   ;;  %v4191_v42 = vld [vmem:[#allocation10 + $0x1b4] ss:$8 sps:$4 sm:$0xff]  }
 0x320   :  { %2090 = vmatpush2.bf16.msra.mxu1 %v4099_v31  ;;  %v4189_v31 = vld [vmem:[#allocation10 + $0x1b0] ss:$8 sps:$4 sm:$0xff]  }
 0x321   :  { %2161 = vmatpush2.bf16.msra.mxu0 %v4102_v43  ;;  %2641 = vmatprep.subr.bf16.mxu1 %v4107_v33  ;;  %v4194_v43 = vld [vmem:[#allocation10 + $0x1a4] ss:$8 sps:$4 sm:$0xff]   ;;  %v4192_v33 = vld [vmem:[#allocation10 + $0x1a0] ss:$8 sps:$4 sm:$0xff]  }
 0x322   :  { %2712 = vmatprep.subr.bf16.mxu0 %v4155_v55 }
 0x323   :  { %2092 = vmatmul.mubr.bf16.vlgmr.msra.gmra.mxu1 %v4689_v5  ;;  %v4114_v5 = vld [vmem:[#allocation10 + $0x40] ss:$8 sps:$4 sm:$0xff]  }
 0x324   :  { %2163 = vmatmul.mubr.bf16.vlgmr.msra.gmra.mxu0 %v4691_v6  ;;  %2101 = vmatprep.mubr.bf16.mxu1 %v4707_v46  ;;  %v4119_v6 = vld [vmem:[#allocation10 + $0x34] ss:$8 sps:$4 sm:$0xff]   ;;  %v4117_v46 = vld [vmem:[#allocation10 + $0x30] ss:$8 sps:$4 sm:$0xff]  }
 0x325   :  { %2172 = vmatprep.mubr.bf16.mxu0 %v4709_v47  ;;  %2642 = vmatpush1.bf16.msra.mxu1 %v4105_v44  ;;  %v4122_v47 = vld [vmem:[#allocation10 + $0x24] ss:$8 sps:$4 sm:$0xff]   ;;  %v4197_v44 = vld [vmem:[#allocation10 + $0x194] ss:$8 sps:$4 sm:$0xff]  }
 0x326   :  { %2643 = vmatprep.subr.bf16.mxu1 %v4110_v34  ;;  %2713 = vmatpush1.bf16.msra.mxu0 %v4153_v56  ;;  %v4195_v34 = vld [vmem:[#allocation10 + $0x190] ss:$8 sps:$4 sm:$0xff]  }
 0x329   :  { %2644 = vmatpush1.bf16.msra.mxu1 %v4108_v49  ;;  %v4200_v49 = vld [vmem:[#allocation10 + $0x184] ss:$8 sps:$4 sm:$0xff]  }
 0x32a   :  { %2645 = vmatprep.subr.bf16.mxu1 %v4113_v50  ;;  %v4198_v50 = vld [vmem:[#allocation10 + $0x180] ss:$8 sps:$4 sm:$0xff]  }
 0x32b   :  { %2102 = vmatmul.mubr.bf16.gmra.mxu1 %v4701_v41  ;;  %v4120_v41 = vld [vmem:[#allocation10 + $0x20] ss:$8 sps:$4 sm:$0xff]  }
 0x32c   :  { %2173 = vmatmul.mubr.bf16.gmra.mxu0 %v4703_v32  ;;  %2111 = vmatprep.mubr.bf16.mxu1 %v4727_v22  ;;  %v4125_v32 = vld [vmem:[#allocation10 + $0x14] ss:$8 sps:$4 sm:$0xff]   ;;  %v4158_v22 = vld [vmem:[#allocation10 + $0x164] ss:$8 sps:$4 sm:$0xff]  }
 0x32d   :  { %2182 = vmatprep.mubr.bf16.mxu0 %v4729_v25  ;;  %2646 = vmatpush1.bf16.msra.mxu1 %v4111_v51  ;;  %v4156_v25 = vld [vmem:[#allocation10 + $0x160] ss:$8 sps:$4 sm:$0xff]   ;;  %v4768_v51 = vld [vmem:[%s4955_s8] sm:$0xf] }
 0x32e   :  { %2647 = vmatprep.subr.bf16.mxu1 %v4116_v52  ;;  %2714 = vmatprep.subr.bf16.mxu0 %v4158_v22  ;;  %v4772_v52 = vrot.slane %v4768_v51, %v4629_v27 }
 0x32f   :  { %2715 = vmatpush1.bf16.msra.mxu0 %v4156_v25 }
 0x330   :  { %2716 = vmatprep.subr.bf16.mxu0 %v4161_v58 }
 0x331   :  { %2648 = vmatpush1.bf16.msra.mxu1 %v4114_v5  ;;  %v4776_v5 = vrot.slane %v4768_v51, %v4632_v28 }
 0x332   :  { %2649 = vmatprep.subr.bf16.mxu1 %v4119_v6 }
 0x333   :  { %2112 = vmatmul.mubr.bf16.gmra.mxu1 %v4721_v15  ;;  %v4128_v15 = vld [vmem:[#allocation10 + $0x4] ss:$8 sps:$4 sm:$0xff]  }
 0x334   :  { %2183 = vmatmul.mubr.bf16.gmra.mxu0 %v4723_v16  ;;  %2121 = vmatprep.mubr.bf16.mxu1 %v4736_v45  ;;  %v4159_v16 = vld [vmem:[#allocation10 + $0x150] ss:$8 sps:$4 sm:$0xff]   ;;  %v4126_v45 = vld [vmem:[#allocation10] ss:$8 sps:$4 sm:$0xff]  }
 0x335   :  { %2192 = vmatprep.mubr.bf16.mxu0 %v4738_v48  ;;  %2650 = vmatpush1.bf16.msra.mxu1 %v4117_v46  ;;  %v4131_v48 = vld [vmem:[#allocation10 + $0xf4] ss:$8 sps:$4 sm:$0xff]  }
 0x336   :  { %2651 = vmatprep.subr.bf16.mxu1 %v4122_v47  ;;  %2717 = vmatpush1.bf16.msra.mxu0 %v4159_v16 }
 0x337   :  { %2718 = vmatprep.subr.bf16.mxu0 %v4164_v59 }
 0x339   :  { %2652 = vmatpush1.bf16.msra.mxu1 %v4120_v41 }
 0x33a   :  { %2653 = vmatprep.subr.bf16.mxu1 %v4125_v32  ;;  %2719 = vmatpush1.bf16.msra.mxu0 %v4162_v60 }
 0x33b   :  { %2122 = vmatmul.mubr.bf16.gmra.mxu1 %v4742_v53  ;;  %v4165_v53 = vld [vmem:[#allocation10 + $0x130] ss:$8 sps:$4 sm:$0xff]   ;;  %2720 = vmatprep.subr.bf16.mxu0 %v4167_v2 }
 0x33c   :  { %2193 = vmatmul.mubr.bf16.gmra.mxu0 %v4745_v54  ;;  %v4132_v54 = vld [vmem:[#allocation10 + $0xe0] ss:$8 sps:$4 sm:$0xff]  }
 0x33d   :  { %2654 = vmatpush1.bf16.msra.mxu1 %v4123_v57 }
 0x33e   :  { %2655 = vmatprep.subr.bf16.mxu1 %v4128_v15  ;;  %2721 = vmatpush1.bf16.msra.mxu0 %v4165_v53 }
 0x33f   :  { %2722 = vmatprep.subr.bf16.mxu0 %v4170_v3 }
 0x341   :  { %2656 = vmatpush1.bf16.msra.mxu1 %v4126_v45 }
 0x342   :  { %2657 = vmatprep.subr.bf16.mxu1 %v4131_v48  ;;  %2723 = vmatpush1.bf16.msra.mxu0 %v4168_v4 }
 0x343   :  { %2724 = vmatprep.subr.bf16.mxu0 %v4173_v7 }
 0x345   :  { %2658 = vmatpush2.bf16.msra.mxu1 %v4129_v61 }
 0x346   :  { %2659 = vmatprep.subr.bf16.mxu1 %v4134_v62  ;;  %2725 = vmatpush1.bf16.msra.mxu0 %v4171_v9 }
 0x347   :  { %2726 = vmatprep.subr.bf16.mxu0 %v4176_v0 }
 0x349   :  { %2660 = vmatpush2.bf16.msra.mxu1 %v4132_v54 }
 0x34a   :  { %2661 = vmatprep.subr.bf16.mxu1 %v4137_v1  ;;  %2727 = vmatpush1.bf16.msra.mxu0 %v4174_v12 }
 0x34b   :  { %2728 = vmatprep.subr.bf16.mxu0 %v4179_v13 }
 0x34d   :  { %2662 = vmatpush2.bf16.msra.mxu1 %v4135_v63 }
 0x34e   :  { %2663 = vmatprep.subr.bf16.mxu1 %v4140_v8  ;;  %2729 = vmatpush2.bf16.msra.mxu0 %v4177_v18 }
 0x34f   :  { %2730 = vmatprep.subr.bf16.mxu0 %v4182_v19 }
 0x351   :  { %2664 = vmatpush2.bf16.msra.mxu1 %v4138_v10 }
 0x352   :  { %2665 = vmatprep.subr.bf16.mxu1 %v4143_v11  ;;  %2731 = vmatpush2.bf16.msra.mxu0 %v4180_v29 }
 0x353   :  { %2732 = vmatprep.subr.bf16.mxu0 %v4185_v30 }
 0x355   :  { %2666 = vmatpush2.bf16.msra.mxu1 %v4141_v14 }
 0x356   :  { %2667 = vmatprep.subr.bf16.mxu1 %v4146_v17  ;;  %2733 = vmatpush2.bf16.msra.mxu0 %v4183_v39 }
 0x357   :  { %2734 = vmatprep.subr.bf16.mxu0 %v4188_v35 }
 0x359   :  { %2668 = vmatpush2.bf16.msra.mxu1 %v4144_v20 }
 0x35a   :  { %2669 = vmatprep.subr.bf16.mxu1 %v4149_v21  ;;  %2735 = vmatpush2.bf16.msra.mxu0 %v4186_v36 }
 0x35b   :  { %2736 = vmatprep.subr.bf16.mxu0 %v4191_v42 }
 0x35d   :  { %2670 = vmatpush2.bf16.msra.mxu1 %v4147_v37 }
 0x35e   :  { %2671 = vmatprep.subr.bf16.mxu1 %v4152_v38  ;;  %2737 = vmatpush2.bf16.msra.mxu0 %v4189_v31 }
 0x35f   :  { %2738 = vmatprep.subr.bf16.mxu0 %v4194_v43 }
 0x361   :  { %2672 = vmatpush2.bf16.msra.mxu1 %v4150_v40 }
 0x362   :  { %2739 = vmatpush2.bf16.msra.mxu0 %v4192_v33 }
 0x363   :  { %2740 = vmatprep.subr.bf16.mxu0 %v4197_v44 }
 0x366   :  { %2741 = vmatpush2.bf16.msra.mxu0 %v4195_v34 }
 0x367   :  { %2742 = vmatprep.subr.bf16.mxu0 %v4200_v49 }
 0x36a   :  { %2743 = vmatpush2.bf16.msra.mxu0 %v4198_v50 }
 0x3a3   :  { %v1951_v6 = vpop.f32.mrf.mxu1  ;;  %v2022_v46 = vpop.f32.mrf.mxu0 }
 0x3a4   :  { %v1952_v41 = vadd.f32 %v1951_v6, %v4776_v5 }
 0x3a5   :  { %v1953_v47 = vpop.f32.mrf.mxu1  ;;  %v2024_v55 = vpop.f32.mrf.mxu0 }
 0x3a6   :  { %v1954_v56 = vadd.f32 %v1953_v47, %v4772_v52  ;;  %v2023_v48 = vadd.f32 %v2022_v46, %v1952_v41 }
 0x3a7   :  { %v1955_v32 = vpop.f32.mrf.mxu1  ;;  %v2026_v22 = vpop.f32.mrf.mxu0 }
 0x3a8   :  { %v1956_v25 = vadd.f32 %v1955_v32, %v4776_v5  ;;  %v2025_v15 = vadd.f32 %v2024_v55, %v1954_v56  ;;  %v2201_v7 = vmax.f32 %v2023_v48, 0.0 }
 0x3a9   :  { %v1957_v57 = vpop.f32.mrf.mxu1  ;;  %v2028_v45 = vpop.f32.mrf.mxu0 }
 0x3aa   :  { %v2027_v58 = vadd.f32 %v2026_v22, %v1956_v25  ;;  %v1958_v16 = vadd.f32 %v1957_v57, %v4772_v52  ;;  %v2202_v3 = vmax.f32 %v2025_v15, 0.0 }
 0x3ab   :  { %v1961_v59 = vpop.f32.mrf.mxu1 }
 0x3ac   :  { %v2029_v60 = vadd.f32 %v2028_v45, %v1958_v16  ;;  %v1962_v61 = vadd.f32 %v1961_v59, %v4776_v5  ;;  %v2032_v62 = vpop.f32.mrf.mxu0  ;;  %v2205_v2 = vmax.f32 %v2027_v58, 0.0 }
 0x3ad   :  { %v1963_v53 = vpop.f32.mrf.mxu1 }
 0x3ae   :  { %v2206_v54 = vmax.f32 %v2029_v60, 0.0  ;;  %v1964_v1 = vadd.f32 %v1963_v53, %v4772_v52  ;;  %v2034_v4 = vpop.f32.mrf.mxu0  ;;  %v2033_v63 = vadd.f32 %v2032_v62, %v1962_v61  ;;  %v2294_v12 = vpack.c.bf16 %v2205_v2, %v2201_v7 }
 0x3af   :  { %v1965_v8 = vpop.f32.mrf.mxu1  ;;  %v4800_v7 = vrot.slane %v4768_v51, %v611_v24 }
 0x3b0   :  { %v2295_v9 = vpack.c.bf16 %v2206_v54, %v2202_v3  ;;  %v1966_v0 = vadd.f32 %v1965_v8, %v4776_v5  ;;  %v2035_v10 = vadd.f32 %v2034_v4, %v1964_v1  ;;  %v2036_v11 = vpop.f32.mrf.mxu0  ;;  %v2209_v19 = vmax.f32 %v2033_v63, 0.0 }
 0x3b1   :  { %v1967_v13 = vpop.f32.mrf.mxu1 }
 0x3b2   :  { %v1968_v14 = vadd.f32 %v1967_v13, %v4772_v52  ;;  %v2037_v17 = vadd.f32 %v2036_v11, %v1966_v0  ;;  %2673 = vmatprep.mubr.bf16.mxu1 %v2295_v9  ;;  %v2038_v18 = vpop.f32.mrf.mxu0  ;;  %v2210_v21 = vmax.f32 %v2035_v10, 0.0 }
 0x3b3   :  { %v1971_v20 = vpop.f32.mrf.mxu1  ;;  %2674 = vmatmul.mubr.bf16.vlgmr.msra.gmra.mxu1 %v2294_v12 }
 0x3b4   :  { %v2213_v29 = vmax.f32 %v2037_v17, 0.0  ;;  %v1972_v30 = vadd.f32 %v1971_v20, %v4776_v5  ;;  %v2039_v37 = vadd.f32 %v2038_v18, %v1968_v14  ;;  %v2042_v38 = vpop.f32.mrf.mxu0 }
 0x3b5   :  { %v1973_v39 = vpop.f32.mrf.mxu1 }
 0x3b6   :  { %v2214_v35 = vmax.f32 %v2039_v37, 0.0  ;;  %v1974_v40 = vadd.f32 %v1973_v39, %v4772_v52  ;;  %v2044_v36 = vpop.f32.mrf.mxu0  ;;  %v2298_v42 = vpack.c.bf16 %v2213_v29, %v2209_v19  ;;  %v2043_v31 = vadd.f32 %v2042_v38, %v1972_v30 }
 0x3b7   :  { %v1975_v43 = vpop.f32.mrf.mxu1 }
 0x3b8   :  { %v2299_v33 = vpack.c.bf16 %v2214_v35, %v2210_v21  ;;  %v1976_v44 = vadd.f32 %v1975_v43, %v4776_v5  ;;  %v2045_v34 = vadd.f32 %v2044_v36, %v1974_v40  ;;  %v2046_v49 = vpop.f32.mrf.mxu0  ;;  %v2217_v55 = vmax.f32 %v2043_v31, 0.0 }
 0x3b9   :  { %v1977_v50 = vpop.f32.mrf.mxu1 }
 0x3ba   :  { %v1978_v6 = vadd.f32 %v1977_v50, %v4772_v52  ;;  %v2047_v46 = vadd.f32 %v2046_v49, %v1976_v44  ;;  %2683 = vmatprep.mubr.bf16.mxu1 %v2299_v33  ;;  %v2048_v47 = vpop.f32.mrf.mxu0  ;;  %v2218_v41 = vmax.f32 %v2045_v34, 0.0 }
 0x3bb   :  { %2684 = vmatmul.mubr.bf16.gmra.mxu1 %v2298_v42  ;;  %v1981_v56 = vpop.f32.mrf.mxu1 }
 0x3bc   :  { %v2221_v32 = vmax.f32 %v2047_v46, 0.0  ;;  %v2049_v22 = vadd.f32 %v2048_v47, %v1978_v6  ;;  %v1982_v25 = vadd.f32 %v1981_v56, %v4776_v5  ;;  %v2052_v57 = vpop.f32.mrf.mxu0 }
 0x3bd   :  { %v1983_v15 = vpop.f32.mrf.mxu1 }
 0x3be   :  { %v2222_v58 = vmax.f32 %v2049_v22, 0.0  ;;  %v1984_v16 = vadd.f32 %v1983_v15, %v4772_v52  ;;  %v2054_v45 = vpop.f32.mrf.mxu0  ;;  %v2302_v48 = vpack.c.bf16 %v2221_v32, %v2217_v55  ;;  %v2053_v59 = vadd.f32 %v2052_v57, %v1982_v25 }
 0x3bf   :  { %v1985_v60 = vpop.f32.mrf.mxu1  ;;  %v4795_v52 = vrot.slane %v4768_v51, %v615_v23 }
 0x3c0   :  { %v2303_v61 = vpack.c.bf16 %v2222_v58, %v2218_v41  ;;  %v2055_v62 = vadd.f32 %v2054_v45, %v1984_v16  ;;  %v2056_v2 = vpop.f32.mrf.mxu0  ;;  %v2225_v1 = vmax.f32 %v2053_v59, 0.0 }
 0x3c1   :  { %v1986_v53 = vpop.f32.mrf.mxu1 }
 0x3c2   :  { %2693 = vmatprep.mubr.bf16.mxu1 %v2303_v61  ;;  %v2226_v3 = vmax.f32 %v2055_v62, 0.0  ;;  %v2057_v54 = vpop.f32.mrf.mxu0  ;;  %v2306_v5 = vpack.c.bf16 %v2225_v1, %v2225_v1 }
 0x3c3   :  { %2694 = vmatmul.mubr.bf16.gmra.mxu1 %v2302_v48 }
 0x3c4   :  { %v2307_v4 = vpack.c.bf16 %v2226_v3, %v2226_v3 }
 0x3c6   :  { %2703 = vmatprep.mubr.bf16.mxu1 %v2307_v4 }
 0x3cb   :  { %2704 = vmatmul.mubr.bf16.gmra.mxu1 %v2306_v5 }
 0x3e3   :  { %v2093_v63 = vpop.f32.mrf.mxu1 }
 0x3e4   :  { %v2164_v8 = vpop.f32.mrf.mxu0  ;;  %v2094_v11 = vadd.f32 %v2093_v63, %v4800_v7 }
 0x3e5   :  { %v2095_v9 = vpop.f32.mrf.mxu1 }
 0x3e6   :  { %v2096_v0 = vadd.f32 %v2095_v9, %v4795_v52  ;;  %v2166_v10 = vpop.f32.mrf.mxu0  ;;  %v2165_v24 = vadd.f32 %v2164_v8, %v2094_v11 }
 0x3e7   :  { %v2097_v12 = vpop.f32.mrf.mxu1 }
 0x3e8   :  { %v2098_v13 = vadd.f32 %v2097_v12, %v4800_v7  ;;  %v2168_v14 = vpop.f32.mrf.mxu0  ;;  %v2167_v23 = vadd.f32 %v2166_v10, %v2096_v0  ;;  %v2203_v40 = vmax.f32 %v2165_v24, 0.0 }
 0x3e9   :  { %v2099_v17 = vpop.f32.mrf.mxu1 }
 0x3ea   :  { %v2169_v18 = vadd.f32 %v2168_v14, %v2098_v13  ;;  %v2100_v26 = vadd.f32 %v2099_v17, %v4795_v52  ;;  %v2170_v19 = vpop.f32.mrf.mxu0  ;;  %v2204_v37 = vmax.f32 %v2167_v23, 0.0 }
 0x3eb   :  { %v2103_v51 = vpop.f32.mrf.mxu1 }
 0x3ec   :  { %v2171_v20 = vadd.f32 %v2170_v19, %v2100_v26  ;;  %v2174_v21 = vpop.f32.mrf.mxu0  ;;  %v2207_v29 = vmax.f32 %v2169_v18, 0.0  ;;  %v2104_v36 = vadd.f32 %v2103_v51, %v4800_v7 }
 0x3ed   :  { %v2105_v30 = vpop.f32.mrf.mxu1 }
 0x3ee   :  { %v2208_v38 = vmax.f32 %v2171_v20, 0.0  ;;  %v2106_v39 = vadd.f32 %v2105_v30, %v4795_v52  ;;  %v2176_v35 = vpop.f32.mrf.mxu0  ;;  %v2296_v44 = vpack.c.bf16 %v2207_v29, %v2203_v40  ;;  %v2175_v47 = vadd.f32 %v2174_v21, %v2104_v36  ;;  %v4205_v40 = vld [vmem:[%s4958_s11 + $0x68] sm:$0xff]  }
 0x3ef   :  { %v2107_v42 = vpop.f32.mrf.mxu1  ;;  %v4206_v36 = vld [vmem:[%s4958_s11 + $0x28] sm:$0xff]  }
 0x3f0   :  { %v2297_v31 = vpack.c.bf16 %v2208_v38, %v2204_v37  ;;  %v2108_v43 = vadd.f32 %v2107_v42, %v4800_v7  ;;  %v2178_v33 = vpop.f32.mrf.mxu0  ;;  %v2177_v49 = vadd.f32 %v2176_v35, %v2106_v39  ;;  %v2211_v16 = vmax.f32 %v2175_v47, 0.0  ;;  %v4202_v38 = vld [vmem:[%s4958_s11 + $0x38] sm:$0xff]   ;;  %v4203_v39 = vld [vmem:[%s4958_s11 + $0x70] sm:$0xff]   ;;  %v4207_v42 = vld [vmem:[%s4958_s11 + $0x60] sm:$0xff]  }
 0x3f1   :  { %v2109_v34 = vpop.f32.mrf.mxu1  ;;  %v4204_v35 = vld [vmem:[%s4958_s11 + $0x30] sm:$0xff]   ;;  %v4217_v47 = vld [vmem:[%s4960_s13 + $0x38] sm:$0xff]  }
 0x3f2   :  { %v2179_v50 = vadd.f32 %v2178_v33, %v2108_v43  ;;  %v2110_v6 = vadd.f32 %v2109_v34, %v4795_v52  ;;  %v2180_v46 = vpop.f32.mrf.mxu0  ;;  %2744 = vmatprep.mubr.bf16.mxu0 %v2297_v31  ;;  %v2212_v25 = vmax.f32 %v2177_v49, 0.0  ;;  %v4208_v31 = vld [vmem:[%s4958_s11 + $0x20] sm:$0xff]   ;;  %v4209_v43 = vld [vmem:[%s4958_s11 + $0x58] sm:$0xff]   ;;  %v4212_v34 = vld [vmem:[%s4958_s11 + $0x10] sm:$0xff]   ;;  %3731 = vmatprep.subr.bf16.mxu0 %v4217_v47 }
 0x3f3   :  { %v2113_v55 = vpop.f32.mrf.mxu1  ;;  %2745 = vmatmul.mubr.bf16.vlgmr.msra.gmra.mxu0 %v2296_v44  ;;  %v4210_v33 = vld [vmem:[%s4958_s11 + $0x18] sm:$0xff]   ;;  %v4211_v44 = vld [vmem:[%s4958_s11 + $0x50] sm:$0xff]   ;;  %v4213_v49 = vld [vmem:[%s4958_s11 + $0x48] sm:$0xff]  }
 0x3f4   :  { %v2181_v56 = vadd.f32 %v2180_v46, %v2110_v6  ;;  %v2184_v41 = vpop.f32.mrf.mxu0  ;;  %v2215_v32 = vmax.f32 %v2179_v50, 0.0  ;;  %v2114_v45 = vadd.f32 %v2113_v55, %v4800_v7  ;;  %v4214_v50 = vld [vmem:[%s4958_s11 + $0x8] sm:$0xff]   ;;  %v4215_v6 = vld [vmem:[%s4958_s11 + $0x40] sm:$0xff]   ;;  %v4218_v55 = vld [vmem:[%s4960_s13 + $0x30] sm:$0xff]   ;;  %3732 = vmatpush3.bf16.msra.mxu0 %v4217_v47 }
 0x3f5   :  { %v2115_v22 = vpop.f32.mrf.mxu1  ;;  %v4216_v46 = vld [vmem:[%s4958_s11] sm:$0xff]   ;;  %3733 = vmatprep.subr.bf16.mxu0 %v4218_v55 }
 0x3f6   :  { %v2216_v57 = vmax.f32 %v2181_v56, 0.0  ;;  %v2116_v15 = vadd.f32 %v2115_v22, %v4795_v52  ;;  %v2186_v58 = vpop.f32.mrf.mxu0  ;;  %v2300_v62 = vpack.c.bf16 %v2215_v32, %v2211_v16  ;;  %v2185_v4 = vadd.f32 %v2184_v41, %v2114_v45  ;;  %v4219_v56 = vld [vmem:[%s4960_s13 + $0x28] sm:$0xff]  }
 0x3f7   :  { %v2117_v48 = vpop.f32.mrf.mxu1 }
 0x3f8   :  { %v2301_v59 = vpack.c.bf16 %v2216_v57, %v2212_v25  ;;  %v2118_v60 = vadd.f32 %v2117_v48, %v4800_v7  ;;  %v2188_v61 = vpop.f32.mrf.mxu0  ;;  %v2187_v53 = vadd.f32 %v2186_v58, %v2116_v15  ;;  %v2219_v17 = vmax.f32 %v2185_v4, 0.0  ;;  %3734 = vmatpush3.bf16.msra.mxu0 %v4218_v55 }
 0x3f9   :  { %v2119_v2 = vpop.f32.mrf.mxu1  ;;  %3735 = vmatprep.subr.bf16.mxu0 %v4219_v56 }
 0x3fa   :  { %v2189_v3 = vadd.f32 %v2188_v61, %v2118_v60  ;;  %v2120_v54 = vadd.f32 %v2119_v2, %v4795_v52  ;;  %v2190_v1 = vpop.f32.mrf.mxu0  ;;  %2754 = vmatprep.mubr.bf16.mxu0 %v2301_v59  ;;  %v2220_v11 = vmax.f32 %v2187_v53, 0.0 }
 0x3fb   :  { %v2123_v5 = vpop.f32.mrf.mxu1  ;;  %2755 = vmatmul.mubr.bf16.gmra.mxu0 %v2300_v62 }
 0x3fc   :  { %v2191_v63 = vadd.f32 %v2190_v1, %v2120_v54  ;;  %v2194_v8 = vpop.f32.mrf.mxu0  ;;  %v2223_v9 = vmax.f32 %v2189_v3, 0.0  ;;  %v2124_v0 = vadd.f32 %v2123_v5, %v4800_v7  ;;  %3736 = vmatpush3.bf16.msra.mxu0 %v4219_v56  ;;  %v2293_v3 = vld [vmem:[%s4957_s10] sm:$0x3] }
 0x3fd   :  { %v2125_v10 = vpop.f32.mrf.mxu1  ;;  %v2314_v54 = vrot.slane %v2293_v3, %v4632_v28  ;;  %v2318_v1 = vrot.slane %v2293_v3, %v4629_v27 }
 0x3fe   :  { %v2224_v12 = vmax.f32 %v2191_v63, 0.0  ;;  %v2126_v13 = vadd.f32 %v2125_v10, %v4795_v52  ;;  %v2196_v14 = vpop.f32.mrf.mxu0  ;;  %v2304_v24 = vpack.c.bf16 %v2223_v9, %v2219_v17  ;;  %v2195_v51 = vadd.f32 %v2194_v8, %v2124_v0  ;;  %v4201_v52 = vld [vmem:[%s4958_s11 + $0x78] sm:$0xff]  }
 0x3ff   :  { %v2127_v23 = vpop.f32.mrf.mxu1  ;;  %3671 = vmatprep.subr.bf16.mxu1 %v4201_v52 }
 0x400   :  { %v2305_v18 = vpack.c.bf16 %v2224_v12, %v2220_v11  ;;  %v2197_v26 = vadd.f32 %v2196_v14, %v2126_v13  ;;  %v2198_v19 = vpop.f32.mrf.mxu0  ;;  %v2227_v7 = vmax.f32 %v2195_v51, 0.0  ;;  %3672 = vmatpush3.bf16.msra.mxu1 %v4202_v38 }
 0x401   :  { %v2128_v20 = vpop.f32.mrf.mxu1  ;;  %3673 = vmatprep.subr.bf16.mxu1 %v4203_v39 }
 0x402   :  { %v2228_v21 = vmax.f32 %v2197_v26, 0.0  ;;  %v2199_v29 = vpop.f32.mrf.mxu0  ;;  %2764 = vmatprep.mubr.bf16.mxu0 %v2305_v18  ;;  %v2308_v37 = vpack.c.bf16 %v2227_v7, %v2227_v7 }
 0x403   :  { %2765 = vmatmul.mubr.bf16.gmra.mxu0 %v2304_v24 }
 0x404   :  { %v2309_v30 = vpack.c.bf16 %v2228_v21, %v2228_v21  ;;  %3674 = vmatpush3.bf16.msra.mxu1 %v4204_v35 }
 0x405   :  { %3675 = vmatprep.subr.bf16.mxu1 %v4205_v40 }
 0x406   :  { %2774 = vmatprep.mubr.bf16.mxu0 %v2309_v30 }
 0x408   :  { %3676 = vmatpush3.bf16.msra.mxu1 %v4206_v36 }
 0x409   :  { %3677 = vmatprep.subr.bf16.mxu1 %v4207_v42 }
 0x40b   :  { %2775 = vmatmul.mubr.bf16.gmra.mxu0 %v2308_v37 }
 0x40c   :  { %3678 = vmatpush3.bf16.msra.mxu1 %v4208_v31 }
 0x40d   :  { %3679 = vmatprep.subr.bf16.mxu1 %v4209_v43 }
 0x410   :  { %3680 = vmatpush3.bf16.msra.mxu1 %v4210_v33 }
 0x411   :  { %3681 = vmatprep.subr.bf16.mxu1 %v4211_v44 }
 0x414   :  { %3682 = vmatpush3.bf16.msra.mxu1 %v4212_v34 }
 0x415   :  { %3683 = vmatprep.subr.bf16.mxu1 %v4213_v49 }
 0x418   :  { %3684 = vmatpush3.bf16.msra.mxu1 %v4214_v50 }
 0x419   :  { %3685 = vmatprep.subr.bf16.mxu1 %v4215_v6 }
 0x41c   :  { %3686 = vmatpush3.bf16.msra.mxu1 %v4216_v46 }
 0x473   :  { %v2675_v41 = vpop.f32.mrf.mxu1 }
 0x474   :  { %v2676_v5 = vadd.f32 %v2675_v41, %v2314_v54 }
 0x475   :  { %v2677_v32 = vpop.f32.mrf.mxu1 }
 0x476   :  { %v2678_v8 = vadd.f32 %v2677_v32, %v2318_v1 }
 0x477   :  { %v2679_v22 = vpop.f32.mrf.mxu1 }
 0x478   :  { %v2680_v9 = vadd.f32 %v2679_v22, %v2314_v54 }
 0x479   :  { %v2681_v25 = vpop.f32.mrf.mxu1 }
 0x47a   :  { %v2682_v11 = vadd.f32 %v2681_v25, %v2318_v1 }
 0x47b   :  { %v2685_v57 = vpop.f32.mrf.mxu1 }
 0x47c   :  { %v2686_v19 = vadd.f32 %v2685_v57, %v2314_v54 }
 0x47d   :  { %v2687_v15 = vpop.f32.mrf.mxu1 }
 0x47e   :  { %v2688_v20 = vadd.f32 %v2687_v15, %v2318_v1 }
 0x47f   :  { %v2689_v58 = vpop.f32.mrf.mxu1 }
 0x480   :  { %v2690_v21 = vadd.f32 %v2689_v58, %v2314_v54 }
 0x481   :  { %v2691_v16 = vpop.f32.mrf.mxu1 }
 0x482   :  { %v2692_v37 = vadd.f32 %v2691_v16, %v2318_v1 }
 0x483   :  { %v2695_v45 = vpop.f32.mrf.mxu1 }
 0x484   :  { %v2696_v31 = vadd.f32 %v2695_v45, %v2314_v54 }
 0x485   :  { %v2697_v48 = vpop.f32.mrf.mxu1 }
 0x486   :  { %v2698_v49 = vadd.f32 %v2697_v48, %v2318_v1 }
 0x487   :  { %v2699_v59 = vpop.f32.mrf.mxu1 }
 0x488   :  { %v2700_v50 = vadd.f32 %v2699_v59, %v2314_v54 }
 0x489   :  { %v2701_v60 = vpop.f32.mrf.mxu1 }
 0x48a   :  { %v2702_v55 = vadd.f32 %v2701_v60, %v2318_v1 }
 0x48b   :  { %v4873_v61 = vpop.f32.mrf.mxu1 }
 0x48c   :  { %v2706_v48 = vadd.f32 %v4873_v61, %v2314_v54  ;;  %v4221_v61 = vld [vmem:[%s4960_s13 + $0x18] sm:$0xff]   ;;  %v4222_v54 = vld [vmem:[%s4960_s13 + $0x10] sm:$0xff]  }
 0x48d   :  { %v2707_v62 = vpop.f32.mrf.mxu1 }
 0x48e   :  { %v2708_v58 = vadd.f32 %v2707_v62, %v2318_v1  ;;  %v4220_v62 = vld [vmem:[%s4960_s13 + $0x20] sm:$0xff]   ;;  %v4223_v1 = vld [vmem:[%s4960_s13 + $0x8] sm:$0xff]  }
 0x48f   :  { %v2709_v2 = vpop.f32.mrf.mxu1  ;;  %3737 = vmatprep.subr.bf16.mxu0 %v4220_v62 }
 0x490   :  { %3738 = vmatpush3.bf16.msra.mxu0 %v4220_v62 }
 0x491   :  { %v2710_v53 = vpop.f32.mrf.mxu1  ;;  %3739 = vmatprep.subr.bf16.mxu0 %v4221_v61 }
 0x494   :  { %3740 = vmatpush3.bf16.msra.mxu0 %v4221_v61 }
 0x495   :  { %3741 = vmatprep.subr.bf16.mxu0 %v4222_v54 }
 0x498   :  { %3742 = vmatpush3.bf16.msra.mxu0 %v4222_v54 }
 0x499   :  { %3743 = vmatprep.subr.bf16.mxu0 %v4223_v1 }
 0x49c   :  { %3744 = vmatpush3.bf16.msra.mxu0 %v4223_v1 }
 0x4b3   :  { %v2746_v4 = vpop.f32.mrf.mxu0 }
 0x4b4   :  { %v2747_v0 = vadd.f32 %v2746_v4, %v2676_v5 }
 0x4b5   :  { %v2748_v63 = vpop.f32.mrf.mxu0 }
 0x4b6   :  { %v2749_v12 = vadd.f32 %v2748_v63, %v2678_v8  ;;  %v2783_v17 = vmax.f32 %v2747_v0, 0.0 }
 0x4b7   :  { %v2750_v10 = vpop.f32.mrf.mxu0 }
 0x4b8   :  { %v2751_v13 = vadd.f32 %v2750_v10, %v2680_v9  ;;  %v2784_v24 = vmax.f32 %v2749_v12, 0.0  ;;  %v4224_v10 = vld [vmem:[%s4960_s13] sm:$0xff]  }
 0x4b9   :  { %v2752_v14 = vpop.f32.mrf.mxu0  ;;  %3745 = vmatprep.subr.bf16.mxu0 %v4224_v10 }
 0x4ba   :  { %v2785_v23 = vmax.f32 %v2751_v13, 0.0  ;;  %v2753_v18 = vadd.f32 %v2752_v14, %v2682_v11  ;;  %3746 = vmatpush3.bf16.msra.mxu0 %v4224_v10  ;;  %v4225_v11 = vld [vmem:[#allocation11 + $0x18] sm:$0xff]  }
 0x4bb   :  { %v2756_v26 = vpop.f32.mrf.mxu0  ;;  %3755 = vmatprep.subr.bf16.mxu0 %v4225_v11 }
 0x4bc   :  { %v2830_v28 = vpack.c.bf16 %v2785_v23, %v2783_v17  ;;  %v2786_v51 = vmax.f32 %v2753_v18, 0.0  ;;  %v2757_v30 = vadd.f32 %v2756_v26, %v2686_v19  ;;  %v3634_v17 = vld [vmem:[%s4959_s12] ss:$0 sm:$0xff] }
 0x4bd   :  { %v2758_v27 = vpop.f32.mrf.mxu0 }
 0x4be   :  { %v2831_v29 = vpack.c.bf16 %v2786_v51, %v2784_v24  ;;  %v2759_v52 = vadd.f32 %v2758_v27, %v2688_v20  ;;  %v2787_v35 = vmax.f32 %v2757_v30, 0.0 }
 0x4bf   :  { %v2760_v7 = vpop.f32.mrf.mxu0 }
 0x4c0   :  { %v2761_v38 = vadd.f32 %v2760_v7, %v2690_v21  ;;  %2972 = vmatprep.mubr.bf16.mxu1 %v2831_v29  ;;  %v2788_v43 = vmax.f32 %v2759_v52, 0.0 }
 0x4c1   :  { %v2762_v39 = vpop.f32.mrf.mxu0  ;;  %2973 = vmatmul.mubr.bf16.vlgmr.msra.gmra.mxu1 %v2830_v28 }
 0x4c2   :  { %v2789_v40 = vmax.f32 %v2761_v38, 0.0  ;;  %v2763_v36 = vadd.f32 %v2762_v39, %v2692_v37 }
 0x4c3   :  { %v2766_v42 = vpop.f32.mrf.mxu0 }
 0x4c4   :  { %v2832_v33 = vpack.c.bf16 %v2789_v40, %v2787_v35  ;;  %v2790_v44 = vmax.f32 %v2763_v36, 0.0  ;;  %v2767_v46 = vadd.f32 %v2766_v42, %v2696_v31 }
 0x4c5   :  { %v2768_v34 = vpop.f32.mrf.mxu0 }
 0x4c6   :  { %v2833_v6 = vpack.c.bf16 %v2790_v44, %v2788_v43  ;;  %v2769_v56 = vadd.f32 %v2768_v34, %v2698_v49  ;;  %v2791_v22 = vmax.f32 %v2767_v46, 0.0 }
 0x4c7   :  { %v2770_v47 = vpop.f32.mrf.mxu0 }
 0x4c8   :  { %v2771_v41 = vadd.f32 %v2770_v47, %v2700_v50  ;;  %2980 = vmatprep.mubr.bf16.mxu1 %v2833_v6  ;;  %v2792_v16 = vmax.f32 %v2769_v56, 0.0 }
 0x4c9   :  { %v2772_v32 = vpop.f32.mrf.mxu0  ;;  %2981 = vmatmul.mubr.bf16.gmra.mxu1 %v2832_v33 }
 0x4ca   :  { %v2793_v25 = vmax.f32 %v2771_v41, 0.0  ;;  %v2773_v57 = vadd.f32 %v2772_v32, %v2702_v55 }
 0x4cb   :  { %v2776_v15 = vpop.f32.mrf.mxu0 }
 0x4cc   :  { %v2834_v45 = vpack.c.bf16 %v2793_v25, %v2791_v22  ;;  %v2794_v2 = vmax.f32 %v2773_v57, 0.0  ;;  %v2777_v4 = vadd.f32 %v2776_v15, %v2706_v48  ;;  %v4226_v15 = vld [vmem:[#allocation11 + $0x10] sm:$0xff]   ;;  %v3651_v48 = vld [vmem:[%s4961_s14] ss:$0 sm:$0xff] }
 0x4cd   :  { %v2778_v59 = vpop.f32.mrf.mxu0 }
 0x4ce   :  { %v2835_v53 = vpack.c.bf16 %v2794_v2, %v2792_v16  ;;  %v2779_v3 = vadd.f32 %v2778_v59, %v2708_v58  ;;  %v2795_v9 = vmax.f32 %v2777_v4, 0.0  ;;  %v4227_v58 = vld [vmem:[#allocation11 + $0x8] sm:$0xff]   ;;  %v4228_v16 = vld [vmem:[#allocation11] sm:$0xff]  }
 0x4cf   :  { %v2780_v60 = vpop.f32.mrf.mxu0 }
 0x4d0   :  { %v2796_v5 = vmax.f32 %v2779_v3, 0.0  ;;  %2988 = vmatprep.mubr.bf16.mxu1 %v2835_v53  ;;  %v2836_v0 = vpack.c.bf16 %v2795_v9, %v2795_v9 }
 0x4d1   :  { %v2781_v63 = vpop.f32.mrf.mxu0  ;;  %2989 = vmatmul.mubr.bf16.gmra.mxu1 %v2834_v45 }
 0x4d2   :  { %v2837_v8 = vpack.c.bf16 %v2796_v5, %v2796_v5 }
 0x4d4   :  { %2996 = vmatprep.mubr.bf16.mxu1 %v2837_v8 }
 0x4d9   :  { %2997 = vmatmul.mubr.bf16.gmra.mxu1 %v2836_v0 }
 0x581   :  { %v3687_v12 = vpop.f32.mrf.mxu1 }
 0x583   :  { %v3688_v13 = vpop.f32.mrf.mxu1 }
 0x584   :  { %v3689_v14 = vadd.f32 %v3688_v13, %v3687_v12 }
 0x585   :  { %v3690_v23 = vpop.f32.mrf.mxu1 }
 0x586   :  { %v2975_v26 = vadd.f32 %v3689_v14, %v3634_v17 }
 0x587   :  { %v3691_v18 = vpop.f32.mrf.mxu1 }
 0x588   :  { %v3692_v19 = vadd.f32 %v3691_v18, %v3690_v23  ;;  %v3004_v27 = vmax.f32 %v2975_v26, 0.0 }
 0x589   :  { %v3693_v24 = vpop.f32.mrf.mxu1 }
 0x58a   :  { %v2978_v28 = vadd.f32 %v3692_v19, %v3634_v17 }
 0x58b   :  { %v3694_v51 = vpop.f32.mrf.mxu1 }
 0x58c   :  { %v3005_v20 = vmax.f32 %v2978_v28, 0.0  ;;  %v3695_v21 = vadd.f32 %v3694_v51, %v3693_v24  ;;  %v3660_v24 = vld [vmem:[%s4963_s16] ss:$0 sm:$0xff] }
 0x58d   :  { %v3696_v29 = vpop.f32.mrf.mxu1 }
 0x58e   :  { %v3028_v30 = vpack.c.bf16 %v3005_v20, %v3004_v27  ;;  %v2983_v37 = vadd.f32 %v3695_v21, %v3634_v17  ;;  %v3669_v20 = vld [vmem:[%s4964_s17] ss:$0 sm:$0xff] }
 0x58f   :  { %v3697_v7 = vpop.f32.mrf.mxu1 }
 0x590   :  { %v3698_v52 = vadd.f32 %v3697_v7, %v3696_v29  ;;  %3747 = vmatprep.mubr.bf16.mxu0 %v3028_v30  ;;  %v3006_v40 = vmax.f32 %v2983_v37, 0.0 }
 0x591   :  { %v3699_v38 = vpop.f32.mrf.mxu1 }
 0x592   :  { %v2986_v39 = vadd.f32 %v3698_v52, %v3634_v17 }
 0x593   :  { %v3700_v35 = vpop.f32.mrf.mxu1 }
 0x594   :  { %v3007_v36 = vmax.f32 %v2986_v39, 0.0  ;;  %v3701_v42 = vadd.f32 %v3700_v35, %v3699_v38 }
 0x595   :  { %v3702_v31 = vpop.f32.mrf.mxu1 }
 0x596   :  { %v3029_v43 = vpack.c.bf16 %v3007_v36, %v3006_v40  ;;  %v2991_v44 = vadd.f32 %v3701_v42, %v3634_v17 }
 0x597   :  { %v3703_v33 = vpop.f32.mrf.mxu1 }
 0x598   :  { %v3704_v34 = vadd.f32 %v3703_v33, %v3702_v31  ;;  %3748 = vmatmul.mubr.bf16.vlgmr.msra.gmra.mxu0 %v3029_v43  ;;  %v3008_v46 = vmax.f32 %v2991_v44, 0.0 }
 0x599   :  { %v3705_v49 = vpop.f32.mrf.mxu1  ;;  %3756 = vmatpush3.bf16.msra.mxu0 %v4225_v11 }
 0x59a   :  { %v2994_v50 = vadd.f32 %v3704_v34, %v3634_v17  ;;  %3757 = vmatprep.subr.bf16.mxu0 %v4226_v15 }
 0x59b   :  { %v3706_v6 = vpop.f32.mrf.mxu1 }
 0x59c   :  { %v3009_v47 = vmax.f32 %v2994_v50, 0.0  ;;  %v3707_v55 = vadd.f32 %v3706_v6, %v3705_v49 }
 0x59d   :  { %v3708_v56 = vpop.f32.mrf.mxu1  ;;  %3758 = vmatpush3.bf16.msra.mxu0 %v4226_v15 }
 0x59e   :  { %v2999_v41 = vadd.f32 %v3707_v55, %v3634_v17  ;;  %v3030_v32 = vpack.c.bf16 %v3009_v47, %v3008_v46  ;;  %3759 = vmatprep.subr.bf16.mxu0 %v4227_v58 }
 0x59f   :  { %v3709_v22 = vpop.f32.mrf.mxu1 }
 0x5a0   :  { %v3010_v25 = vmax.f32 %v2999_v41, 0.0  ;;  %3751 = vmatprep.mubr.bf16.mxu0 %v3030_v32 }
 0x5a1   :  { %3760 = vmatpush3.bf16.msra.mxu0 %v4227_v58 }
 0x5a2   :  { %v3031_v57 = vpack.c.bf16 %v3010_v25, %v3010_v25  ;;  %3761 = vmatprep.subr.bf16.mxu0 %v4228_v16 }
 0x5a4   :  { %3752 = vmatmul.mubr.bf16.gmra.mxu0 %v3031_v57 }
 0x5a5   :  { %3762 = vmatpush3.bf16.msra.mxu0 %v4228_v16 }
 0x658   :  { %v3749_v45 = vpop.f32.mrf.mxu0 }
 0x659   :  { %v3129_v4 = vadd.f32 %v3749_v45, %v3651_v48 }
 0x65a   :  { %v3120_v2 = vpop.f32.mrf.mxu0 }
 0x65b   :  { %v3121_v53 = vadd.f32 %v3651_v48, %v3120_v2  ;;  %v3152_v0 = vmax.f32 %v3129_v4, 0.0  ;;  %v3670_v2 = vld [vmem:[#allocation2] ss:$0 sm:$0xff] }
 0x65c   :  { %v3750_v59 = vpop.f32.mrf.mxu0 }
 0x65d   :  { %v3132_v3 = vadd.f32 %v3750_v59, %v3651_v48  ;;  %v3150_v8 = vmax.f32 %v3121_v53, 0.0 }
 0x65e   :  { %v3123_v60 = vpop.f32.mrf.mxu0 }
 0x65f   :  { %v3124_v5 = vadd.f32 %v3651_v48, %v3123_v60  ;;  %v3153_v63 = vmax.f32 %v3132_v3, 0.0 }
 0x661   :  { %v3151_v9 = vmax.f32 %v3124_v5, 0.0  ;;  %v3167_v61 = vpack.c.bf16 %v3153_v63, %v3152_v0 }
 0x663   :  { %v3166_v62 = vpack.c.bf16 %v3151_v9, %v3150_v8 }
 0x664   :  { %v3753_v54 = vpop.f32.mrf.mxu0 }
 0x665   :  { %3763 = vmatprep.mubr.msk.bf16.mxu0 %vm3200_vm2, %v3166_v62  ;;  %v3145_v10 = vadd.f32 %v3753_v54, %v3651_v48 }
 0x666   :  { %v3136_v1 = vpop.f32.mrf.mxu0  ;;  %3764 = vmatmul.mubr.msk.bf16.vlgmr.msra.gmra.mxu0 %vm3200_vm2, %v3167_v61 }
 0x667   :  { %v3137_v12 = vadd.f32 %v3651_v48, %v3136_v1  ;;  %v3156_v17 = vmax.f32 %v3145_v10, 0.0 }
 0x668   :  { %v3754_v11 = vpop.f32.mrf.mxu0 }
 0x669   :  { %v3154_v23 = vmax.f32 %v3137_v12, 0.0  ;;  %v3169_v19 = vpack.c.bf16 %v3156_v17, %v3156_v17 }
 0x66a   :  { %v3139_v13 = vpop.f32.mrf.mxu0 }
 0x66b   :  { %v3140_v14 = vadd.f32 %v3651_v48, %v3139_v13 }
 0x66d   :  { %v3155_v18 = vmax.f32 %v3140_v14, 0.0 }
 0x66f   :  { %v3168_v26 = vpack.c.bf16 %v3155_v18, %v3154_v23 }
 0x671   :  { %3767 = vmatprep.mubr.msk.bf16.mxu0 %vm3200_vm2, %v3168_v26 }
 0x672   :  { %3768 = vmatmul.mubr.msk.bf16.gmra.mxu0 %vm3200_vm2, %v3169_v19 }
 0x726   :  { %v3765_v28 = vpop.f32.mrf.mxu0 }
 0x727   :  { %v3256_v51 = vadd.f32 %v3765_v28, %v3660_v24 }
 0x728   :  { %v3247_v27 = vpop.f32.mrf.mxu0 }
 0x729   :  { %v3279_v21 = vmax.f32 %v3256_v51, 0.0  ;;  %v3248_v29 = vadd.f32 %v3660_v24, %v3247_v27 }
 0x72a   :  { %v3766_v30 = vpop.f32.mrf.mxu0 }
 0x72b   :  { %v3277_v7 = vmax.f32 %v3248_v29, 0.0  ;;  %v3259_v37 = vadd.f32 %v3766_v30, %v3660_v24  ;;  %v3294_v52 = vmul.f32 %v3669_v20, %v3279_v21 }
 0x72c   :  { %v3250_v38 = vpop.f32.mrf.mxu0 }
 0x72d   :  { %v3280_v39 = vmax.f32 %v3259_v37, 0.0  ;;  %v3251_v35 = vadd.f32 %v3660_v24, %v3250_v38  ;;  %v3305_v40 = vsel %vm3200_vm2, %v3294_v52, 0.0  ;;  %v3292_v36 = vmul.f32 %v3669_v20, %v3277_v7 }
 0x72e   :  { %3306 = vadd.xlane.f32.xlu1 %v3305_v40 }
 0x72f   :  { %v3278_v42 = vmax.f32 %v3251_v35, 0.0  ;;  %v3299_v31 = vsel %vm3200_vm2, %v3292_v36, 0.0  ;;  %v3295_v43 = vmul.f32 %v3669_v20, %v3280_v39 }
 0x730   :  { %3300 = vadd.xlane.f32.xlu0 %v3299_v31 }
 0x731   :  { %v3308_v33 = vsel %vm3200_vm2, %v3295_v43, 0.0  ;;  %v3293_v44 = vmul.f32 %v3669_v20, %v3278_v42 }
 0x732   :  { %3309 = vadd.xlane.f32.xlu1 %v3308_v33  ;;  %v3769_v34 = vpop.f32.mrf.mxu0 }
 0x733   :  { %v3272_v49 = vadd.f32 %v3769_v34, %v3660_v24  ;;  %v3302_v50 = vsel %vm3200_vm2, %v3293_v44, 0.0 }
 0x734   :  { %v3263_v6 = vpop.f32.mrf.mxu0  ;;  %3303 = vadd.xlane.f32.xlu0 %v3302_v50 }
 0x735   :  { %v3264_v46 = vadd.f32 %v3660_v24, %v3263_v6  ;;  %v3283_v55 = vmax.f32 %v3272_v49, 0.0 }
 0x736   :  { %v3770_v47 = vpop.f32.mrf.mxu0 }
 0x737   :  { %v3281_v56 = vmax.f32 %v3264_v46, 0.0  ;;  %v3298_v15 = vmul.f32 %v3669_v20, %v3283_v55 }
 0x738   :  { %v3266_v41 = vpop.f32.mrf.mxu0 }
 0x739   :  { %v3267_v32 = vadd.f32 %v3660_v24, %v3266_v41  ;;  %v3296_v22 = vmul.f32 %v3669_v20, %v3281_v56  ;;  %v3317_v45 = vsel %vm3200_vm2, %v3298_v15, 0.0 }
 0x73b   :  { %v3282_v25 = vmax.f32 %v3267_v32, 0.0  ;;  %v3311_v57 = vsel %vm3200_vm2, %v3296_v22, 0.0 }
 0x73c   :  { %3312 = vadd.xlane.f32.xlu0 %v3311_v57 }
 0x73d   :  { %v3297_v58 = vmul.f32 %v3669_v20, %v3282_v25 }
 0x73f   :  { %v3314_v16 = vsel %vm3200_vm2, %v3297_v58, 0.0 }
 0x740   :  { %3315 = vadd.xlane.f32.xlu1 %v3314_v16  ;;  %3318 = vadd.xlane.f32.xlu0 %v3317_v45 }
 0x7b7   :  { %v3307_v48 = vpop.xlane.xlu1 %3306 }
 0x7b8   :  { %v3328_v59 = vadd.f32 %v3670_v2, %v3307_v48 }
 0x7b9   :  { %v3301_v53 = vpop.xlane.xlu0 %3300 }
 0x7ba   :  { %3335 = vst.msk [vmem:[%s4966_s19 + $0x10] sm:$0xff] %vm240_vm0, %v3328_v59  ;;  %v3326_v3 = vadd.f32 %v3670_v2, %v3301_v53 }
 0x7bb   :  { %v3310_v4 = vpop.xlane.xlu1 %3309 }
 0x7bc   :  { %3333 = vst.msk [vmem:[%s4966_s19] sm:$0xff] %vm240_vm0, %v3326_v3  ;;  %v3329_v60 = vadd.f32 %v3670_v2, %v3310_v4 }
 0x7bd   :  { %v3304_v5 = vpop.xlane.xlu0 %3303 }
 0x7be   :  { %3336 = vst.msk [vmem:[%s4966_s19 + $0x18] sm:$0xff] %vm240_vm0, %v3329_v60  ;;  %v3327_v63 = vadd.f32 %v3670_v2, %v3304_v5 }
 0x7c0   :  { %3334 = vst.msk [vmem:[%s4966_s19 + $0x8] sm:$0xff] %vm240_vm0, %v3327_v63 }
 0x7c5   :  { %v3313_v8 = vpop.xlane.xlu0 %3312 }
 0x7c6   :  { %v3330_v9 = vadd.f32 %v3670_v2, %v3313_v8 }
 0x7c8   :  { %3337 = vst.msk [vmem:[%s4966_s19 + $0x20] sm:$0xff] %vm240_vm0, %v3330_v9 }
 0x7c9   :  { %v3316_v0 = vpop.xlane.xlu1 %3315  ;;  %v3319_v62 = vpop.xlane.xlu0 %3318 }
 0x7ca   :  { %v3331_v61 = vadd.f32 %v3670_v2, %v3316_v0  ;;  %v3332_v54 = vadd.f32 %v3670_v2, %v3319_v62 }
 0x7cc   :  { %3338 = vst.msk [vmem:[%s4966_s19 + $0x28] sm:$0xff] %vm240_vm0, %v3331_v61  ;;  %3339 = vst.msk [vmem:[%s4966_s19 + $0x30] sm:$0xff] %vm240_vm0, %v3332_v54 }
 0x7cd   :  { %3344 = vsyncpa [#allocation4], 1 }
 0x7ce   :  { %3345 = vsyncpa [#allocation6], 1 }
 0x7cf   :  { %3346 = vsyncpa [#allocation9], 1 }
 0x7d0   :  { %3347 = vsyncpa [#allocation12], 1 }

</bundles_post_ra>
